<compile_context>
chip_gen: v7x
topology: tpu7x:2x2x1
jax: 0.10.0
libtpu: 0.0.40
codegen_flags: <defaults>
</compile_context>

<pallas_src>
import functools

import jax
import jax.numpy as jnp
from jax import lax
from jax.experimental import pallas as pl
from jax.experimental.pallas import tpu as pltpu

LN_EPS = 1e-6  # matches nn.LayerNorm(d_model, eps=1e-6) in the reference repo


def _decoder_layer_kernel(
    x_ref, kp_ref, vp_ref, bias_ref, npad_ref,
    wq_ref, bq_ref, wo_ref, bo_ref, ln1g_ref, ln1b_ref,
    w1_ref, b1_ref, w2_ref, b2_ref, ln2g_ref, ln2b_ref,
    out_ref, attn_ref,
    *, n_head, d_k, d_v):
  f32 = jnp.float32
  bf16 = jnp.bfloat16

  x = x_ref[0].astype(f32)     # (TQ, D)
  kp = kp_ref[0]               # (H, Lk, d_k) bf16 (projected once, in the wrapper)
  vp = vp_ref[0]               # (H, Lk, d_v) bf16
  bias = bias_ref[0]           # (TQ, Lk) bf16 additive mask: 0 keep / -1e9 masked
  npad = npad_ref[0]           # (TQ, 1) f32

  def layer_norm(z, g, b):
    mu = jnp.mean(z, axis=-1, keepdims=True)
    c = z - mu
    var = jnp.mean(c * c, axis=-1, keepdims=True)   # two-pass: no cancellation
    return c * lax.rsqrt(var + LN_EPS) * g + b

  # ---- MultiHeadAttention (normalize_before=True: pre-norm applied to q only) ----
  residual = x
  xn = layer_norm(x, ln1g_ref[...], ln1b_ref[...])

  # Single full-width Q projection (1/sqrt(d_k) folded into wq/bq in the wrapper);
  # bf16 MXU operands, f32 accumulation.
  q_full = jnp.dot(xn.astype(bf16), wq_ref[...],
                   preferred_element_type=f32) + bq_ref[...]         # (TQ, H*d_k)
  # Head split is pure layout movement (static lane slices), no MXU work.
  q = jnp.stack([q_full[:, h * d_k:(h + 1) * d_k] for h in range(n_head)],
                axis=0).astype(bf16)                                 # (H, TQ, d_k)

  sc = jnp.einsum('hqd,hkd->hqk', q, kp,
                  preferred_element_type=f32)                        # (H, TQ, Lk)
  sc = sc + bias.astype(f32)[None]                                   # one mask add for all heads
  sc = sc - jnp.max(sc, axis=-1, keepdims=True)
  p = jnp.exp(sc)
  p = p * pl.reciprocal(jnp.sum(p, axis=-1, keepdims=True))          # exact: rows sum to 1
  # TODO(synk): attention / output / FFN dropout layers treated as eval-mode identity.
  attn_ref[0] = p.astype(attn_ref.dtype)

  ctx = jnp.einsum('hqk,hkd->hqd', p.astype(bf16), vp,
                   preferred_element_type=f32)                       # (H, TQ, d_v)
  # Head reduction folded into the MXU contraction: (TQ, H*d_v) @ (H*d_v, D).
  ctx_flat = jnp.concatenate([ctx[h] for h in range(n_head)], axis=-1)
  attn_out = (jnp.dot(ctx_flat.astype(bf16), wo_ref[...],
                      preferred_element_type=f32)
              + bo_ref[...] + residual)
  attn_out = attn_out * npad           # dec_output *= non_pad_mask (before pos_ffn)

  # ---- PositionwiseFeedForward (pre-norm) ----
  res2 = attn_out
  yn = layer_norm(attn_out, ln2g_ref[...], ln2b_ref[...])
  hid = jnp.maximum(
      jnp.dot(yn.astype(bf16), w1_ref[...], preferred_element_type=f32) + b1_ref[...],
      0.0)
  y = jnp.dot(hid.astype(bf16), w2_ref[...], preferred_element_type=f32) + b2_ref[...]
  y = (y + res2) * npad                # dec_output *= non_pad_mask (after pos_ffn)

  out_ref[0] = y.astype(out_ref.dtype)


def _pick_q_tile(lq, lk, n_head):
  """Largest q tile (multiple of 8, <= 256) whose f32 score/prob intermediates
  (~3 live copies of (H, tq, Lk)) stay well inside the smallest per-core VMEM
  budget (v7x: 64 MiB)."""
  lq8 = -(-lq // 8) * 8
  tq = min(256, lq8)
  budget = 24 << 20
  while tq > 8 and 3 * n_head * tq * lk * 4 > budget:
    tq = max(8, ((tq // 2) + 7) // 8 * 8)
  return tq


def _vmem_limit_bytes():
  """Generation-aware VMEM budget: most of the core's capacity (128 MiB on v5e/v6e,
  64 MiB on v7x) minus headroom for compiler-internal scratch."""
  try:
    cap = int(pltpu.get_tpu_info().vmem_capacity_bytes)
  except Exception:
    cap = 64 << 20
  return int(max(32 << 20, min(cap - (16 << 20), 100 << 20)))


def decoder_layer(dec_input, k, v, params, *, n_head, d_k, d_v,
                  non_pad_mask=None, slf_attn_mask=None,
                  attn_dtype=jnp.float32):
  B, Lq, D = dec_input.shape
  Lk = k.shape[1]
  bf16, f32 = jnp.bfloat16, jnp.float32

  # ---- K/V projections hoisted out of the q-tile loop (computed once, not n_q times).
  k_b = k.astype(bf16)
  if v is k:
    # Fuse Wk|Wv into one wider matmul when k and v are the same tensor.
    wkv = jnp.concatenate([params["wk"], params["wv"]], axis=1).astype(bf16)
    bkv = jnp.concatenate([params["bk"], params["bv"]], axis=0).astype(f32)
    kv = jnp.einsum('bld,de->ble', k_b, wkv, preferred_element_type=f32) + bkv
    kp_flat, vp_flat = kv[..., :n_head * d_k], kv[..., n_head * d_k:]
  else:
    kp_flat = jnp.einsum('bld,de->ble', k_b, params["wk"].astype(bf16),
                         preferred_element_type=f32) + params["bk"]
    vp_flat = jnp.einsum('bld,de->ble', v.astype(bf16), params["wv"].astype(bf16),
                         preferred_element_type=f32) + params["bv"]
  kp = jnp.transpose(kp_flat.reshape(B, Lk, n_head, d_k), (0, 2, 1, 3)).astype(bf16)
  vp = jnp.transpose(vp_flat.reshape(B, Lk, n_head, d_v), (0, 2, 1, 3)).astype(bf16)

  # ---- Masks: additive bias in bf16 (half the HBM read of the f32 version).
  if slf_attn_mask is None:
    attn_bias = jnp.zeros((B, Lq, Lk), bf16)
  else:
    attn_bias = jnp.where(slf_attn_mask == 0,
                          jnp.float32(-1e9), jnp.float32(0.0)).astype(bf16)
  if non_pad_mask is None:
    npad = jnp.ones((B, Lq, 1), f32)
  else:
    npad = non_pad_mask.astype(f32)

  x_in = dec_input.astype(f32)

  # ---- q-tile choice + padding so no rows are dropped when Lq % tq != 0.
  tq = _pick_q_tile(Lq, Lk, n_head)
  n_q = pl.cdiv(Lq, tq)
  lq_pad = n_q * tq
  if lq_pad != Lq:
    pad = lq_pad - Lq
    x_in = jnp.pad(x_in, ((0, 0), (0, pad), (0, 0)))
    attn_bias = jnp.pad(attn_bias, ((0, 0), (0, pad), (0, 0)))
    npad = jnp.pad(npad, ((0, 0), (0, pad), (0, 0)))

  scale = 1.0 / float(d_k) ** 0.5     # folded into wq / bq

  def row2(a):
    return a.reshape(1, -1).astype(f32)

  weight_args = (
      (params["wq"] * scale).astype(bf16), row2(params["bq"] * scale),
      params["wo"].astype(bf16), row2(params["bo"]),
      row2(params["ln1_g"]), row2(params["ln1_b"]),
      params["w1"].astype(bf16), row2(params["b1"]),
      params["w2"].astype(bf16), row2(params["b2"]),
      row2(params["ln2_g"]), row2(params["ln2_b"]),
  )

  def full_spec(arr):
    return pl.BlockSpec(arr.shape, lambda b, qi, _n=arr.ndim: (0,) * _n)

  in_specs = [
      pl.BlockSpec((1, tq, D), lambda b, qi: (b, qi, 0)),               # dec_input (q tile)
      pl.BlockSpec((1, n_head, Lk, d_k), lambda b, qi: (b, 0, 0, 0)),   # kp (resident along q)
      pl.BlockSpec((1, n_head, Lk, d_v), lambda b, qi: (b, 0, 0, 0)),   # vp
      pl.BlockSpec((1, tq, Lk), lambda b, qi: (b, qi, 0)),              # additive attn bias
      pl.BlockSpec((1, tq, 1), lambda b, qi: (b, qi, 0)),               # non_pad_mask
  ] + [full_spec(w) for w in weight_args]

  out_specs = [
      pl.BlockSpec((1, tq, D), lambda b, qi: (b, qi, 0)),
      pl.BlockSpec((1, n_head, tq, Lk), lambda b, qi: (b, 0, qi, 0)),
  ]

  kernel = functools.partial(_decoder_layer_kernel, n_head=n_head, d_k=d_k, d_v=d_v)

  out, attn = pl.pallas_call(
      kernel,
      out_shape=(jax.ShapeDtypeStruct((B, lq_pad, D), f32),
                 jax.ShapeDtypeStruct((B, n_head, lq_pad, Lk), attn_dtype)),
      grid=(B, n_q),
      in_specs=in_specs,
      out_specs=out_specs,
      compiler_params=pltpu.CompilerParams(
          dimension_semantics=("parallel", "parallel"),
          vmem_limit_bytes=_vmem_limit_bytes()),
  )(x_in, kp, vp, attn_bias, npad, *weight_args)

  if lq_pad != Lq:
    out = out[:, :Lq]
    attn = attn[:, :, :Lq]
  return out, attn


def init_params(key, d_model, d_inner, n_head, d_k, d_v):
  ks = jax.random.split(key, 12)
  s = 0.05
  return {
      "wq": jax.random.normal(ks[0], (d_model, n_head * d_k), jnp.float32) * s,
      "bq": jax.random.normal(ks[1], (n_head * d_k,), jnp.float32) * 0.01,
      "wk": jax.random.normal(ks[2], (d_model, n_head * d_k), jnp.float32) * s,
      "bk": jax.random.normal(ks[3], (n_head * d_k,), jnp.float32) * 0.01,
      "wv": jax.random.normal(ks[4], (d_model, n_head * d_v), jnp.float32) * s,
      "bv": jax.random.normal(ks[5], (n_head * d_v,), jnp.float32) * 0.01,
      "wo": jax.random.normal(ks[6], (n_head * d_v, d_model), jnp.float32) * s,
      "bo": jax.random.normal(ks[7], (d_model,), jnp.float32) * 0.01,
      "ln1_g": jnp.ones((d_model,), jnp.float32),
      "ln1_b": jnp.zeros((d_model,), jnp.float32),
      "w1": jax.random.normal(ks[8], (d_model, d_inner), jnp.float32) * s,
      "b1": jax.random.normal(ks[9], (d_inner,), jnp.float32) * 0.01,
      "w2": jax.random.normal(ks[10], (d_inner, d_model), jnp.float32) * s,
      "b2": jax.random.normal(ks[11], (d_model,), jnp.float32) * 0.01,
      "ln2_g": jnp.ones((d_model,), jnp.float32),
      "ln2_b": jnp.zeros((d_model,), jnp.float32),
  }


if __name__ == "__main__":
  B, Lq, Lk = 2, 8, 8
  d_model, d_inner, n_head, d_k, d_v = 32, 64, 4, 8, 8

  key = jax.random.PRNGKey(0)
  k_x, k_k, k_v, k_p, k_m = jax.random.split(key, 5)

  dec_input = jax.random.normal(k_x, (B, Lq, d_model), jnp.float32)
  enc_k = jax.random.normal(k_k, (B, Lk, d_model), jnp.float32)
  enc_v = jax.random.normal(k_v, (B, Lk, d_model), jnp.float32)

  params = init_params(k_p, d_model, d_inner, n_head, d_k, d_v)

  # masks: 1 = keep, 0 = masked (matches masked_fill(mask == 0, -1e9))
  slf_attn_mask = jnp.broadcast_to(
      jnp.tril(jnp.ones((Lq, Lk), jnp.float32)), (B, Lq, Lk))
  non_pad_mask = (jax.random.uniform(k_m, (B, Lq, 1)) > 0.2).astype(jnp.float32)

  dec_output, attn = decoder_layer(
      dec_input, enc_k, enc_v, params,
      n_head=n_head, d_k=d_k, d_v=d_v,
      non_pad_mask=non_pad_mask, slf_attn_mask=slf_attn_mask)

  jax.block_until_ready((dec_output, attn))
  assert dec_output.shape == (B, Lq, d_model)
  assert attn.shape == (B, n_head, Lq, Lk)
  assert bool(jnp.all(jnp.isfinite(dec_output)))
  assert bool(jnp.all(jnp.isfinite(attn)))
  print("KERNEL_OK")
</pallas_src>

<mosaic_0001>
module attributes {stable_mosaic.version = 11 : i64} {
  func.func @_decoder_layer_kernel(%arg0: i32, %arg1: i32, %arg2: memref<1x8x32xf32, #tpu.memory_space<vmem>>, %arg3: memref<1x4x8x8xbf16, #tpu.memory_space<vmem>>, %arg4: memref<1x4x8x8xbf16, #tpu.memory_space<vmem>>, %arg5: memref<1x8x8xbf16, #tpu.memory_space<vmem>>, %arg6: memref<1x8x1xf32, #tpu.memory_space<vmem>>, %arg7: memref<32x32xbf16, #tpu.memory_space<vmem>>, %arg8: memref<1x32xf32, #tpu.memory_space<vmem>>, %arg9: memref<32x32xbf16, #tpu.memory_space<vmem>>, %arg10: memref<1x32xf32, #tpu.memory_space<vmem>>, %arg11: memref<1x32xf32, #tpu.memory_space<vmem>>, %arg12: memref<1x32xf32, #tpu.memory_space<vmem>>, %arg13: memref<32x64xbf16, #tpu.memory_space<vmem>>, %arg14: memref<1x64xf32, #tpu.memory_space<vmem>>, %arg15: memref<64x32xbf16, #tpu.memory_space<vmem>>, %arg16: memref<1x32xf32, #tpu.memory_space<vmem>>, %arg17: memref<1x32xf32, #tpu.memory_space<vmem>>, %arg18: memref<1x32xf32, #tpu.memory_space<vmem>>, %arg19: memref<1x8x32xf32, #tpu.memory_space<vmem>>, %arg20: memref<1x4x8x8xf32, #tpu.memory_space<vmem>>) attributes {dimension_semantics = [#tpu.dimension_semantics<parallel>, #tpu.dimension_semantics<parallel>], iteration_bounds = array<i64: 2, 1>, scalar_prefetch = 0 : i64, scratch_operands = 0 : i64, tpu.core_type = #tpu.core_type<tc>, window_params = [{transform_indices = @transform_0, window_bounds = array<i64: 1, 8, 32>}, {transform_indices = @transform_1, window_bounds = array<i64: 1, 4, 8, 8>}, {transform_indices = @transform_2, window_bounds = array<i64: 1, 4, 8, 8>}, {transform_indices = @transform_3, window_bounds = array<i64: 1, 8, 8>}, {transform_indices = @transform_4, window_bounds = array<i64: 1, 8, 1>}, {pipeline_mode = #tpu.pipeline_mode<synchronous>, transform_indices = @transform_5, window_bounds = array<i64: 32, 32>}, {pipeline_mode = #tpu.pipeline_mode<synchronous>, transform_indices = @transform_6, window_bounds = array<i64: 1, 32>}, {pipeline_mode = #tpu.pipeline_mode<synchronous>, transform_indices = @transform_7, window_bounds = array<i64: 32, 32>}, {pipeline_mode = #tpu.pipeline_mode<synchronous>, transform_indices = @transform_8, window_bounds = array<i64: 1, 32>}, {pipeline_mode = #tpu.pipeline_mode<synchronous>, transform_indices = @transform_9, window_bounds = array<i64: 1, 32>}, {pipeline_mode = #tpu.pipeline_mode<synchronous>, transform_indices = @transform_10, window_bounds = array<i64: 1, 32>}, {pipeline_mode = #tpu.pipeline_mode<synchronous>, transform_indices = @transform_11, window_bounds = array<i64: 32, 64>}, {pipeline_mode = #tpu.pipeline_mode<synchronous>, transform_indices = @transform_12, window_bounds = array<i64: 1, 64>}, {pipeline_mode = #tpu.pipeline_mode<synchronous>, transform_indices = @transform_13, window_bounds = array<i64: 64, 32>}, {pipeline_mode = #tpu.pipeline_mode<synchronous>, transform_indices = @transform_14, window_bounds = array<i64: 1, 32>}, {pipeline_mode = #tpu.pipeline_mode<synchronous>, transform_indices = @transform_15, window_bounds = array<i64: 1, 32>}, {pipeline_mode = #tpu.pipeline_mode<synchronous>, transform_indices = @transform_16, window_bounds = array<i64: 1, 32>}, {transform_indices = @transform_17, window_bounds = array<i64: 1, 8, 32>}, {transform_indices = @transform_18, window_bounds = array<i64: 1, 4, 8, 8>}]} {
    %c0 = arith.constant 0 : index
    %c0_0 = arith.constant 0 : index
    %c0_1 = arith.constant 0 : index
    %0 = vector.load %arg2[%c0, %c0_0, %c0_1] : memref<1x8x32xf32, #tpu.memory_space<vmem>>, vector<1x8x32xf32>
    %1 = vector.shape_cast %0 : vector<1x8x32xf32> to vector<8x32xf32>
    %c0_2 = arith.constant 0 : index
    %c0_3 = arith.constant 0 : index
    %c0_4 = arith.constant 0 : index
    %c0_5 = arith.constant 0 : index
    %2 = vector.load %arg3[%c0_2, %c0_3, %c0_4, %c0_5] : memref<1x4x8x8xbf16, #tpu.memory_space<vmem>>, vector<1x4x8x8xbf16>
    %3 = vector.shape_cast %2 : vector<1x4x8x8xbf16> to vector<4x8x8xbf16>
    %c0_6 = arith.constant 0 : index
    %c0_7 = arith.constant 0 : index
    %c0_8 = arith.constant 0 : index
    %c0_9 = arith.constant 0 : index
    %4 = vector.load %arg4[%c0_6, %c0_7, %c0_8, %c0_9] : memref<1x4x8x8xbf16, #tpu.memory_space<vmem>>, vector<1x4x8x8xbf16>
    %5 = vector.shape_cast %4 : vector<1x4x8x8xbf16> to vector<4x8x8xbf16>
    %c0_10 = arith.constant 0 : index
    %c0_11 = arith.constant 0 : index
    %c0_12 = arith.constant 0 : index
    %6 = vector.load %arg5[%c0_10, %c0_11, %c0_12] : memref<1x8x8xbf16, #tpu.memory_space<vmem>>, vector<1x8x8xbf16>
    %7 = vector.shape_cast %6 : vector<1x8x8xbf16> to vector<8x8xbf16>
    %c0_13 = arith.constant 0 : index
    %c0_14 = arith.constant 0 : index
    %c0_15 = arith.constant 0 : index
    %8 = vector.load %arg6[%c0_13, %c0_14, %c0_15] : memref<1x8x1xf32, #tpu.memory_space<vmem>>, vector<1x8x1xf32>
    %9 = vector.shape_cast %8 : vector<1x8x1xf32> to vector<8x1xf32>
    %c0_16 = arith.constant 0 : index
    %c0_17 = arith.constant 0 : index
    %10 = vector.load %arg11[%c0_16, %c0_17] : memref<1x32xf32, #tpu.memory_space<vmem>>, vector<1x32xf32>
    %c0_18 = arith.constant 0 : index
    %c0_19 = arith.constant 0 : index
    %11 = vector.load %arg12[%c0_18, %c0_19] : memref<1x32xf32, #tpu.memory_space<vmem>>, vector<1x32xf32>
    %cst = arith.constant dense<0.000000e+00> : vector<8xf32>
    %12 = vector.multi_reduction <add>, %1, %cst [1] : vector<8x32xf32> to vector<8xf32>
    %13 = vector.shape_cast %12 : vector<8xf32> to vector<8x1xf32>
    %cst_20 = arith.constant 3.200000e+01 : f32
    %14 = vector.broadcast %cst_20 : f32 to vector<8x1xf32>
    %15 = arith.divf %13, %14 : vector<8x1xf32>
    %16 = vector.broadcast %15 : vector<8x1xf32> to vector<8x32xf32>
    %17 = arith.subf %1, %16 : vector<8x32xf32>
    %18 = arith.mulf %17, %17 : vector<8x32xf32>
    %cst_21 = arith.constant dense<0.000000e+00> : vector<8xf32>
    %19 = vector.multi_reduction <add>, %18, %cst_21 [1] : vector<8x32xf32> to vector<8xf32>
    %20 = vector.shape_cast %19 : vector<8xf32> to vector<8x1xf32>
    %cst_22 = arith.constant 3.200000e+01 : f32
    %21 = vector.broadcast %cst_22 : f32 to vector<8x1xf32>
    %22 = arith.divf %20, %21 : vector<8x1xf32>
    %cst_23 = arith.constant 9.99999997E-7 : f32
    %23 = vector.broadcast %cst_23 : f32 to vector<8x1xf32>
    %24 = arith.addf %22, %23 : vector<8x1xf32>
    %25 = math.rsqrt %24 : vector<8x1xf32>
    %26 = vector.broadcast %25 : vector<8x1xf32> to vector<8x32xf32>
    %27 = arith.mulf %17, %26 : vector<8x32xf32>
    %28 = vector.broadcast %10 : vector<1x32xf32> to vector<8x32xf32>
    %29 = arith.mulf %27, %28 : vector<8x32xf32>
    %30 = vector.broadcast %11 : vector<1x32xf32> to vector<8x32xf32>
    %31 = arith.addf %29, %30 : vector<8x32xf32>
    %32 = arith.truncf %31 : vector<8x32xf32> to vector<8x32xbf16>
    %c0_24 = arith.constant 0 : index
    %c0_25 = arith.constant 0 : index
    %33 = vector.load %arg7[%c0_24, %c0_25] : memref<32x32xbf16, #tpu.memory_space<vmem>>, vector<32x32xbf16>
    %cst_26 = arith.constant dense<0.000000e+00> : vector<8x32xf32>
    %34 = tpu.matmul %32, %33, %cst_26 {dimension_numbers = #tpu.dot_dimension_numbers<[1], [0], [0], [1], [0, 0, 1, 1], [], []>} : vector<8x32xbf16>, vector<32x32xbf16>, vector<8x32xf32> -> vector<8x32xf32>
    %c0_27 = arith.constant 0 : index
    %c0_28 = arith.constant 0 : index
    %35 = vector.load %arg8[%c0_27, %c0_28] : memref<1x32xf32, #tpu.memory_space<vmem>>, vector<1x32xf32>
    %36 = vector.broadcast %35 : vector<1x32xf32> to vector<8x32xf32>
    %37 = arith.addf %34, %36 : vector<8x32xf32>
    %38 = vector.extract_strided_slice %37 {offsets = [0, 0], sizes = [8, 8], strides = [1, 1]} : vector<8x32xf32> to vector<8x8xf32>
    %39 = vector.extract_strided_slice %37 {offsets = [0, 8], sizes = [8, 8], strides = [1, 1]} : vector<8x32xf32> to vector<8x8xf32>
    %40 = vector.extract_strided_slice %37 {offsets = [0, 16], sizes = [8, 8], strides = [1, 1]} : vector<8x32xf32> to vector<8x8xf32>
    %41 = vector.extract_strided_slice %37 {offsets = [0, 24], sizes = [8, 8], strides = [1, 1]} : vector<8x32xf32> to vector<8x8xf32>
    %42 = vector.shape_cast %38 : vector<8x8xf32> to vector<1x8x8xf32>
    %43 = vector.shape_cast %39 : vector<8x8xf32> to vector<1x8x8xf32>
    %44 = vector.shape_cast %40 : vector<8x8xf32> to vector<1x8x8xf32>
    %45 = vector.shape_cast %41 : vector<8x8xf32> to vector<1x8x8xf32>
    %46 = tpu.concatenate %42, %43, %44, %45 in 0 : vector<1x8x8xf32>, vector<1x8x8xf32>, vector<1x8x8xf32>, vector<1x8x8xf32> -> vector<4x8x8xf32>
    %47 = arith.truncf %46 : vector<4x8x8xf32> to vector<4x8x8xbf16>
    "tpu.trace_start"() <{level = 10 : i32, message = "hqd,hkd->hqk"}> : () -> ()
    %cst_29 = arith.constant dense<0.000000e+00> : vector<4x8x8xf32>
    %48 = tpu.matmul %47, %3, %cst_29 {dimension_numbers = #tpu.dot_dimension_numbers<[2], [2], [1], [1], [0, 0, 0, 1, 1, 1], [0], [0]>} : vector<4x8x8xbf16>, vector<4x8x8xbf16>, vector<4x8x8xf32> -> vector<4x8x8xf32>
    "tpu.trace_stop"() : () -> ()
    %49 = arith.extf %7 : vector<8x8xbf16> to vector<8x8xf32>
    %50 = vector.shape_cast %49 : vector<8x8xf32> to vector<1x8x8xf32>
    %51 = vector.broadcast %50 : vector<1x8x8xf32> to vector<4x8x8xf32>
    %52 = arith.addf %48, %51 : vector<4x8x8xf32>
    %cst_30 = arith.constant dense<0xFF800000> : vector<4x8xf32>
    %53 = vector.multi_reduction <maximumf>, %52, %cst_30 [2] : vector<4x8x8xf32> to vector<4x8xf32>
    %54 = vector.shape_cast %53 : vector<4x8xf32> to vector<4x8x1xf32>
    %55 = vector.broadcast %54 : vector<4x8x1xf32> to vector<4x8x8xf32>
    %56 = arith.subf %52, %55 : vector<4x8x8xf32>
    %57 = math.exp %56 : vector<4x8x8xf32>
    %cst_31 = arith.constant dense<0.000000e+00> : vector<4x8xf32>
    %58 = vector.multi_reduction <add>, %57, %cst_31 [2] : vector<4x8x8xf32> to vector<4x8xf32>
    %59 = vector.shape_cast %58 : vector<4x8xf32> to vector<4x8x1xf32>
    %60 = tpu.reciprocal %59 : vector<4x8x1xf32> -> vector<4x8x1xf32>
    %61 = vector.broadcast %60 : vector<4x8x1xf32> to vector<4x8x8xf32>
    %62 = arith.mulf %57, %61 : vector<4x8x8xf32>
    %c0_32 = arith.constant 0 : index
    %c0_33 = arith.constant 0 : index
    %c0_34 = arith.constant 0 : index
    %c0_35 = arith.constant 0 : index
    %63 = vector.load %arg20[%c0_32, %c0_33, %c0_34, %c0_35] : memref<1x4x8x8xf32, #tpu.memory_space<vmem>>, vector<1x4x8x8xf32>
    %64 = vector.shape_cast %63 : vector<1x4x8x8xf32> to vector<4x8x8xf32>
    %65 = vector.shape_cast %62 : vector<4x8x8xf32> to vector<1x4x8x8xf32>
    tpu.vector_store %arg20[%c0_32, %c0_33, %c0_34, %c0_35], %65 {strides = array<i32>} : memref<1x4x8x8xf32, #tpu.memory_space<vmem>>, vector<1x4x8x8xf32>,
    %66 = arith.truncf %62 : vector<4x8x8xf32> to vector<4x8x8xbf16>
    "tpu.trace_start"() <{level = 10 : i32, message = "hqk,hkd->hqd"}> : () -> ()
    %cst_36 = arith.constant dense<0.000000e+00> : vector<4x8x8xf32>
    %67 = tpu.matmul %66, %5, %cst_36 {dimension_numbers = #tpu.dot_dimension_numbers<[2], [1], [1], [2], [0, 0, 0, 1, 1, 2], [0], [0]>} : vector<4x8x8xbf16>, vector<4x8x8xbf16>, vector<4x8x8xf32> -> vector<4x8x8xf32>
    "tpu.trace_stop"() : () -> ()
    %68 = vector.extract_strided_slice %67 {offsets = [0, 0, 0], sizes = [1, 8, 8], strides = [1, 1, 1]} : vector<4x8x8xf32> to vector<1x8x8xf32>
    %69 = vector.shape_cast %68 : vector<1x8x8xf32> to vector<8x8xf32>
    %70 = vector.extract_strided_slice %67 {offsets = [1, 0, 0], sizes = [1, 8, 8], strides = [1, 1, 1]} : vector<4x8x8xf32> to vector<1x8x8xf32>
    %71 = vector.shape_cast %70 : vector<1x8x8xf32> to vector<8x8xf32>
    %72 = vector.extract_strided_slice %67 {offsets = [2, 0, 0], sizes = [1, 8, 8], strides = [1, 1, 1]} : vector<4x8x8xf32> to vector<1x8x8xf32>
    %73 = vector.shape_cast %72 : vector<1x8x8xf32> to vector<8x8xf32>
    %74 = vector.extract_strided_slice %67 {offsets = [3, 0, 0], sizes = [1, 8, 8], strides = [1, 1, 1]} : vector<4x8x8xf32> to vector<1x8x8xf32>
    %75 = vector.shape_cast %74 : vector<1x8x8xf32> to vector<8x8xf32>
    %76 = tpu.concatenate %69, %71, %73, %75 in 1 : vector<8x8xf32>, vector<8x8xf32>, vector<8x8xf32>, vector<8x8xf32> -> vector<8x32xf32>
    %77 = arith.truncf %76 : vector<8x32xf32> to vector<8x32xbf16>
    %c0_37 = arith.constant 0 : index
    %c0_38 = arith.constant 0 : index
    %78 = vector.load %arg9[%c0_37, %c0_38] : memref<32x32xbf16, #tpu.memory_space<vmem>>, vector<32x32xbf16>
    %cst_39 = arith.constant dense<0.000000e+00> : vector<8x32xf32>
    %79 = tpu.matmul %77, %78, %cst_39 {dimension_numbers = #tpu.dot_dimension_numbers<[1], [0], [0], [1], [0, 0, 1, 1], [], []>} : vector<8x32xbf16>, vector<32x32xbf16>, vector<8x32xf32> -> vector<8x32xf32>
    %c0_40 = arith.constant 0 : index
    %c0_41 = arith.constant 0 : index
    %80 = vector.load %arg10[%c0_40, %c0_41] : memref<1x32xf32, #tpu.memory_space<vmem>>, vector<1x32xf32>
    %81 = vector.broadcast %80 : vector<1x32xf32> to vector<8x32xf32>
    %82 = arith.addf %79, %81 : vector<8x32xf32>
    %83 = arith.addf %82, %1 : vector<8x32xf32>
    %84 = vector.broadcast %9 : vector<8x1xf32> to vector<8x32xf32>
    %85 = arith.mulf %83, %84 : vector<8x32xf32>
    %c0_42 = arith.constant 0 : index
    %c0_43 = arith.constant 0 : index
    %86 = vector.load %arg17[%c0_42, %c0_43] : memref<1x32xf32, #tpu.memory_space<vmem>>, vector<1x32xf32>
    %c0_44 = arith.constant 0 : index
    %c0_45 = arith.constant 0 : index
    %87 = vector.load %arg18[%c0_44, %c0_45] : memref<1x32xf32, #tpu.memory_space<vmem>>, vector<1x32xf32>
    %cst_46 = arith.constant dense<0.000000e+00> : vector<8xf32>
    %88 = vector.multi_reduction <add>, %85, %cst_46 [1] : vector<8x32xf32> to vector<8xf32>
    %89 = vector.shape_cast %88 : vector<8xf32> to vector<8x1xf32>
    %cst_47 = arith.constant 3.200000e+01 : f32
    %90 = vector.broadcast %cst_47 : f32 to vector<8x1xf32>
    %91 = arith.divf %89, %90 : vector<8x1xf32>
    %92 = vector.broadcast %91 : vector<8x1xf32> to vector<8x32xf32>
    %93 = arith.subf %85, %92 : vector<8x32xf32>
    %94 = arith.mulf %93, %93 : vector<8x32xf32>
    %cst_48 = arith.constant dense<0.000000e+00> : vector<8xf32>
    %95 = vector.multi_reduction <add>, %94, %cst_48 [1] : vector<8x32xf32> to vector<8xf32>
    %96 = vector.shape_cast %95 : vector<8xf32> to vector<8x1xf32>
    %cst_49 = arith.constant 3.200000e+01 : f32
    %97 = vector.broadcast %cst_49 : f32 to vector<8x1xf32>
    %98 = arith.divf %96, %97 : vector<8x1xf32>
    %cst_50 = arith.constant 9.99999997E-7 : f32
    %99 = vector.broadcast %cst_50 : f32 to vector<8x1xf32>
    %100 = arith.addf %98, %99 : vector<8x1xf32>
    %101 = math.rsqrt %100 : vector<8x1xf32>
    %102 = vector.broadcast %101 : vector<8x1xf32> to vector<8x32xf32>
    %103 = arith.mulf %93, %102 : vector<8x32xf32>
    %104 = vector.broadcast %86 : vector<1x32xf32> to vector<8x32xf32>
    %105 = arith.mulf %103, %104 : vector<8x32xf32>
    %106 = vector.broadcast %87 : vector<1x32xf32> to vector<8x32xf32>
    %107 = arith.addf %105, %106 : vector<8x32xf32>
    %108 = arith.truncf %107 : vector<8x32xf32> to vector<8x32xbf16>
    %c0_51 = arith.constant 0 : index
    %c0_52 = arith.constant 0 : index
    %109 = vector.load %arg13[%c0_51, %c0_52] : memref<32x64xbf16, #tpu.memory_space<vmem>>, vector<32x64xbf16>
    %cst_53 = arith.constant dense<0.000000e+00> : vector<8x64xf32>
    %110 = tpu.matmul %108, %109, %cst_53 {dimension_numbers = #tpu.dot_dimension_numbers<[1], [0], [0], [1], [0, 0, 1, 1], [], []>} : vector<8x32xbf16>, vector<32x64xbf16>, vector<8x64xf32> -> vector<8x64xf32>
    %c0_54 = arith.constant 0 : index
    %c0_55 = arith.constant 0 : index
    %111 = vector.load %arg14[%c0_54, %c0_55] : memref<1x64xf32, #tpu.memory_space<vmem>>, vector<1x64xf32>
    %112 = vector.broadcast %111 : vector<1x64xf32> to vector<8x64xf32>
    %113 = arith.addf %110, %112 : vector<8x64xf32>
    %cst_56 = arith.constant 0.000000e+00 : f32
    %114 = vector.broadcast %cst_56 : f32 to vector<8x64xf32>
    %115 = arith.maximumf %113, %114 : vector<8x64xf32>
    %116 = arith.truncf %115 : vector<8x64xf32> to vector<8x64xbf16>
    %c0_57 = arith.constant 0 : index
    %c0_58 = arith.constant 0 : index
    %117 = vector.load %arg15[%c0_57, %c0_58] : memref<64x32xbf16, #tpu.memory_space<vmem>>, vector<64x32xbf16>
    %cst_59 = arith.constant dense<0.000000e+00> : vector<8x32xf32>
    %118 = tpu.matmul %116, %117, %cst_59 {dimension_numbers = #tpu.dot_dimension_numbers<[1], [0], [0], [1], [0, 0, 1, 1], [], []>} : vector<8x64xbf16>, vector<64x32xbf16>, vector<8x32xf32> -> vector<8x32xf32>
    %c0_60 = arith.constant 0 : index
    %c0_61 = arith.constant 0 : index
    %119 = vector.load %arg16[%c0_60, %c0_61] : memref<1x32xf32, #tpu.memory_space<vmem>>, vector<1x32xf32>
    %120 = vector.broadcast %119 : vector<1x32xf32> to vector<8x32xf32>
    %121 = arith.addf %118, %120 : vector<8x32xf32>
    %122 = arith.addf %121, %85 : vector<8x32xf32>
    %123 = vector.broadcast %9 : vector<8x1xf32> to vector<8x32xf32>
    %124 = arith.mulf %122, %123 : vector<8x32xf32>
    %c0_62 = arith.constant 0 : index
    %c0_63 = arith.constant 0 : index
    %c0_64 = arith.constant 0 : index
    %125 = vector.load %arg19[%c0_62, %c0_63, %c0_64] : memref<1x8x32xf32, #tpu.memory_space<vmem>>, vector<1x8x32xf32>
    %126 = vector.shape_cast %125 : vector<1x8x32xf32> to vector<8x32xf32>
    %127 = vector.shape_cast %124 : vector<8x32xf32> to vector<1x8x32xf32>
    tpu.vector_store %arg19[%c0_62, %c0_63, %c0_64], %127 {strides = array<i32>} : memref<1x8x32xf32, #tpu.memory_space<vmem>>, vector<1x8x32xf32>,
    return
  }
  func.func @transform_0(%arg0: i32, %arg1: i32) -> (i32, i32, i32) {
    %c0_i32 = arith.constant 0 : i32
    %c0_i32_0 = arith.constant 0 : i32
    return %arg0, %arg1, %c0_i32 : i32, i32, i32
  }
  func.func @transform_1(%arg0: i32, %arg1: i32) -> (i32, i32, i32, i32) {
    %c0_i32 = arith.constant 0 : i32
    %c0_i32_0 = arith.constant 0 : i32
    %c0_i32_1 = arith.constant 0 : i32
    %c0_i32_2 = arith.constant 0 : i32
    return %arg0, %c0_i32, %c0_i32_0, %c0_i32_1 : i32, i32, i32, i32
  }
  func.func @transform_2(%arg0: i32, %arg1: i32) -> (i32, i32, i32, i32) {
    %c0_i32 = arith.constant 0 : i32
    %c0_i32_0 = arith.constant 0 : i32
    %c0_i32_1 = arith.constant 0 : i32
    %c0_i32_2 = arith.constant 0 : i32
    return %arg0, %c0_i32, %c0_i32_0, %c0_i32_1 : i32, i32, i32, i32
  }
  func.func @transform_3(%arg0: i32, %arg1: i32) -> (i32, i32, i32) {
    %c0_i32 = arith.constant 0 : i32
    %c0_i32_0 = arith.constant 0 : i32
    return %arg0, %arg1, %c0_i32 : i32, i32, i32
  }
  func.func @transform_4(%arg0: i32, %arg1: i32) -> (i32, i32, i32) {
    %c0_i32 = arith.constant 0 : i32
    %c0_i32_0 = arith.constant 0 : i32
    return %arg0, %arg1, %c0_i32 : i32, i32, i32
  }
  func.func @transform_5(%arg0: i32, %arg1: i32) -> (i32, i32) {
    %c0_i32 = arith.constant 0 : i32
    %c0_i32_0 = arith.constant 0 : i32
    %c0_i32_1 = arith.constant 0 : i32
    return %c0_i32, %c0_i32_0 : i32, i32
  }
  func.func @transform_6(%arg0: i32, %arg1: i32) -> (i32, i32) {
    %c0_i32 = arith.constant 0 : i32
    %c0_i32_0 = arith.constant 0 : i32
    %c0_i32_1 = arith.constant 0 : i32
    return %c0_i32, %c0_i32_0 : i32, i32
  }
  func.func @transform_7(%arg0: i32, %arg1: i32) -> (i32, i32) {
    %c0_i32 = arith.constant 0 : i32
    %c0_i32_0 = arith.constant 0 : i32
    %c0_i32_1 = arith.constant 0 : i32
    return %c0_i32, %c0_i32_0 : i32, i32
  }
  func.func @transform_8(%arg0: i32, %arg1: i32) -> (i32, i32) {
    %c0_i32 = arith.constant 0 : i32
    %c0_i32_0 = arith.constant 0 : i32
    %c0_i32_1 = arith.constant 0 : i32
    return %c0_i32, %c0_i32_0 : i32, i32
  }
  func.func @transform_9(%arg0: i32, %arg1: i32) -> (i32, i32) {
    %c0_i32 = arith.constant 0 : i32
    %c0_i32_0 = arith.constant 0 : i32
    %c0_i32_1 = arith.constant 0 : i32
    return %c0_i32, %c0_i32_0 : i32, i32
  }
  func.func @transform_10(%arg0: i32, %arg1: i32) -> (i32, i32) {
    %c0_i32 = arith.constant 0 : i32
    %c0_i32_0 = arith.constant 0 : i32
    %c0_i32_1 = arith.constant 0 : i32
    return %c0_i32, %c0_i32_0 : i32, i32
  }
  func.func @transform_11(%arg0: i32, %arg1: i32) -> (i32, i32) {
    %c0_i32 = arith.constant 0 : i32
    %c0_i32_0 = arith.constant 0 : i32
    %c0_i32_1 = arith.constant 0 : i32
    return %c0_i32, %c0_i32_0 : i32, i32
  }
  func.func @transform_12(%arg0: i32, %arg1: i32) -> (i32, i32) {
    %c0_i32 = arith.constant 0 : i32
    %c0_i32_0 = arith.constant 0 : i32
    %c0_i32_1 = arith.constant 0 : i32
    return %c0_i32, %c0_i32_0 : i32, i32
  }
  func.func @transform_13(%arg0: i32, %arg1: i32) -> (i32, i32) {
    %c0_i32 = arith.constant 0 : i32
    %c0_i32_0 = arith.constant 0 : i32
    %c0_i32_1 = arith.constant 0 : i32
    return %c0_i32, %c0_i32_0 : i32, i32
  }
  func.func @transform_14(%arg0: i32, %arg1: i32) -> (i32, i32) {
    %c0_i32 = arith.constant 0 : i32
    %c0_i32_0 = arith.constant 0 : i32
    %c0_i32_1 = arith.constant 0 : i32
    return %c0_i32, %c0_i32_0 : i32, i32
  }
  func.func @transform_15(%arg0: i32, %arg1: i32) -> (i32, i32) {
    %c0_i32 = arith.constant 0 : i32
    %c0_i32_0 = arith.constant 0 : i32
    %c0_i32_1 = arith.constant 0 : i32
    return %c0_i32, %c0_i32_0 : i32, i32
  }
  func.func @transform_16(%arg0: i32, %arg1: i32) -> (i32, i32) {
    %c0_i32 = arith.constant 0 : i32
    %c0_i32_0 = arith.constant 0 : i32
    %c0_i32_1 = arith.constant 0 : i32
    return %c0_i32, %c0_i32_0 : i32, i32
  }
  func.func @transform_17(%arg0: i32, %arg1: i32) -> (i32, i32, i32) {
    %c0_i32 = arith.constant 0 : i32
    %c0_i32_0 = arith.constant 0 : i32
    return %arg0, %arg1, %c0_i32 : i32, i32, i32
  }
  func.func @transform_18(%arg0: i32, %arg1: i32) -> (i32, i32, i32, i32) {
    %c0_i32 = arith.constant 0 : i32
    %c0_i32_0 = arith.constant 0 : i32
    %c0_i32_1 = arith.constant 0 : i32
    return %arg0, %c0_i32, %arg1, %c0_i32_0 : i32, i32, i32, i32
  }
}

</mosaic_0001>

<bundles_post_ra>
// kernel: tpu_custom_call.1
= control target key start
LH: loop header
LB: loop body
LE: loop exit
PB: predicated region body
PF: predicated region fallthrough
CT: control target
= control target key end

     0   :  { %s3163_s0 = inlined_call_operand.hbm [shape: f32[2,8,32], index: 0, kind: input, shape index: {}]   ;;  %s3164_s1 = inlined_call_operand.vmem [shape: bf16[2,4,8,8], index: 1, kind: input, shape index: {}]   ;;  %s3165_s2 = inlined_call_operand.vmem [shape: bf16[2,4,8,8], index: 2, kind: input, shape index: {}]   ;;  %s3166_s3 = inlined_call_operand.hbm [shape: bf16[2,8,8], index: 3, kind: input, shape index: {}]   ;;  %s3167_s4 = inlined_call_operand.vmem [shape: f32[2,8,1], index: 4, kind: input, shape index: {}]   ;;  %s3168_s5 = inlined_call_operand.hbm [shape: bf16[32,32], index: 5, kind: input, shape index: {}]   ;;  %s3169_s6 = inlined_call_operand.hbm [shape: f32[1,32], index: 6, kind: input, shape index: {}]   ;;  %s3170_s7 = inlined_call_operand.hbm [shape: bf16[32,32], index: 7, kind: input, shape index: {}]   ;;  %s3171_s8 = inlined_call_operand.hbm [shape: f32[1,32], index: 8, kind: input, shape index: {}]   ;;  %s3172_s9 = inlined_call_operand.vmem [shape: f32[1,32], index: 9, kind: input, shape index: {}]   ;;  %s3173_s10 = inlined_call_operand.vmem [shape: f32[1,32], index: 10, kind: input, shape index: {}]   ;;  %s3174_s11 = inlined_call_operand.vmem [shape: bf16[32,64], index: 11, kind: input, shape index: {}]   ;;  %s3175_s12 = inlined_call_operand.vmem [shape: f32[1,64], index: 12, kind: input, shape index: {}]   ;;  %s3176_s13 = inlined_call_operand.vmem [shape: bf16[64,32], index: 13, kind: input, shape index: {}]   ;;  %s3177_s14 = inlined_call_operand.vmem [shape: f32[1,32], index: 14, kind: input, shape index: {}]   ;;  %s3178_s15 = inlined_call_operand.vmem [shape: f32[1,32], index: 15, kind: input, shape index: {}]   ;;  %s3179_s16 = inlined_call_operand.vmem [shape: f32[1,32], index: 16, kind: input, shape index: {}]   ;;  %s3180_s17 = inlined_call_operand.hbm [shape: f32[2,8,32], index: 17, kind: output, shape index: {0}]   ;;  %s3181_s18 = inlined_call_operand.hbm [shape: f32[2,4,8,8], index: 18, kind: output, shape index: {1}]  }
   0x1   :  { %3192 = sst [smem:[#allocation23_spill]] %s3163_s0 }
   0x2   :  { %3193 = sst [smem:[#allocation24_spill]] %s3164_s1 }
   0x3   :  { %3194 = sst [smem:[#allocation25_spill]] %s3165_s2 }
   0x4   :  { %3195 = sst [smem:[#allocation26_spill]] %s3167_s4 }
   0x5   :  { %3196 = sst [smem:[#allocation27_spill]] %s3168_s5 }
   0x6   :  { %3197 = sst [smem:[#allocation28_spill]] %s3169_s6 }
   0x7   :  { %3198 = sst [smem:[#allocation29_spill]] %s3170_s7 }
   0x8   :  { %3199 = sst [smem:[#allocation30_spill]] %s3171_s8 }
   0x9   :  { %3200 = sst [smem:[#allocation31_spill]] %s3174_s11 }
   0xa   :  { %3201 = sst [smem:[#allocation32_spill]] %s3175_s12 }
   0xb   :  { %3202 = sst [smem:[#allocation33_spill]] %s3176_s13 }
   0xc   :  { %3203 = sst [smem:[#allocation34_spill]] %s3177_s14 }
   0xd   :  { %3204 = sst [smem:[#allocation35_spill]] %s3178_s15 }
   0xe   :  { %3205 = sst [smem:[#allocation36_spill]] %s3179_s16 }
   0xf   :  { %3206 = sst [smem:[#allocation37_spill]] %s3180_s17 }
  0x10   :  { %3207 = sst [smem:[#allocation38_spill]] %s3181_s18 }
  0x11   :  { %24 = vsyncpa [#allocation3], 0 }
  0x12   :  { %26 = vsyncpa [#allocation3 + $0x1], 0 }
  0x13   :  { %27 = vsyncpa [#allocation6], 0 }
  0x14   :  { %29 = vsyncpa [#allocation6 + $0x1], 0 }
  0x15   :  { %30 = vsyncpa [#allocation9], 0 }
  0x16   :  { %31 = vsyncpa [#allocation12], 0 }
  0x17   :  { %32 = vsyncpa [#allocation4], 0 }
  0x18   :  { %34 = vsyncpa [#allocation4 + $0x1], 0 }
  0x19   :  { %35 = vsyncpa [#allocation15], 0 }
  0x1a   :  { %37 = vsyncpa [#allocation15 + $0x1], 0  ;;  %s2613_s27 = smov 0   ;;  %s2615_s28 = smov 0  }
  0x1b   :  { %s2617_s29 = smov 0   ;;  %s2619_s30 = smov 0  }
  0x1c   :  { %s2621_s0 = smov 0   ;;  %s2623_s19 = smov 0  }
  0x1d LB: > { %s2644_s1 = sadd.s32 4294967295, %s2496_s19   ;;  %p1859_p0 = scmp.ge.s32.totalorder %s2496_s19, 1  ;;  %s2496_s19 = sphi %s2623_s19, %s43_s19   ;;  %s2492_s0 = sphi %s2621_s0, %s3249_s0   ;;  %s2488_s30 = sphi %s2619_s30, %s3248_s30   ;;  %s2484_s29 = sphi %s2617_s29, %s3247_s29   ;;  %s2480_s28 = sphi %s2615_s28, %s3246_s28   ;;  %s2476_s27 = sphi %s2613_s27, %s3245_s27  }
  0x1e   : > { %p3187_p1 = scmp.eq.s32.totalorder %s2644_s1, 0  ;;  %p504_p2 = scmp.lt.s32.totalorder %s2496_s19, 3 }
  0x1f   : > { %s2498_s21 = smov [#allocation7]   ;;  %s2499_s23 = smov [#allocation8]  }
  0x20   : > { %p2649_p3 = pnand %p1859_p0, %p504_p2  ;;  %s516_s22 = sshll.u32 %s2498_s21, 4  ;;  %s2653_s22 = int_to_ptr.vmem [resolvable:$true] %s516_s22 }
  0x21   : > { %s530_s24 = sshll.u32 %s2499_s23, 4  ;;  %s2500_s25 = smov [#allocation10]   ;;  %s2664_s24 = int_to_ptr.vmem [resolvable:$true] %s530_s24 }
  0x22   : > { %s3208_s20 = scalar_select %p2649_p3, 1, 0 }
  0x23   : > { %p2061_p4 = pneg %p2649_p3  ;;  %s2666_s26 = sshll.u32 %s2500_s25, 4  ;;  %s541_s26 = int_to_ptr.vmem [resolvable:$true] %s2666_s26 }
  0x24   : > { %s3210_s5 = sld [smem:[#allocation27_spill]] }
  0x25   : > { %p2660_p6 = pnand %p2061_p4, %p3187_p1 }
  0x27   : > { %p2676_p8 = pneg %p2660_p6 }
  0x2a   : > { %s2194_s14 = scalar_lea.hbm %s3210_s5, 256 }
  0x2b   : > { %p2195_p7 = scmp.ne.s32.totalorder %s3210_s5, %s2194_s14  ;;  %p2201_p11 = scmp.lt.u32.totalorder %s2194_s14, %s3210_s5 }
  0x2d   : > { %p2197_p9 = pnand %p2676_p8, %p2195_p7 }
  0x2f   : > { %p2198_p10 = pneg %p2197_p9 }
  0x31   : > { %p2203_p12 = pnand %p2201_p11, %p2198_p10 }
  0x33   : > { %2206 = shalt.err (!%p2203_p12)
}
  0x34   : > { %s2207_s12 = scalar_lea.vmem %s2653_s22, 256  ;;  %p2215_p4 = scmp.lt.s32.totalorder %s2653_s22, %s2653_s22 }
  0x35   : > { %p2208_p13 = scmp.ne.s32.totalorder %s2653_s22, %s2207_s12  ;;  %p2216_p5 = scmp.lt.s32.totalorder %s2207_s12, %s2207_s12 }
  0x37   : > { %p2210_p0 = pnand %p2208_p13, %p2676_p8  ;;  %p2217_p7 = por %p2216_p5, %p2215_p4 }
  0x39   : > { %p2211_p2 = pneg %p2210_p0 }
  0x3b   : > { %p2218_p9 = pnand %p2217_p7, %p2211_p2 }
  0x3d   : > { %2221 = shalt.err (!%p2218_p9)
}
  0x3e   : > { %s2501_s17 = smov 64   ;;  %s2502_s14 = smov 4  }
  0x3f   : > { %2064 = dma.hbm_to_vmem [thread:$0]  (!%p2660_p6), %s3210_s5, 256, %s2653_s22, [#allocation6], %s2501_s17, %s2501_s17, %s2502_s14  }
  0x40   : > { %s3212_s6 = sld [smem:[#allocation28_spill]] }
  0x46   : > { %s2222_s12 = scalar_lea.hbm %s3212_s6, 16 }
  0x47   : > { %p2223_p5 = scmp.ne.s32.totalorder %s3212_s6, %s2222_s12  ;;  %p2229_p12 = scmp.lt.u32.totalorder %s2222_s12, %s3212_s6 }
  0x49   : > { %p2225_p10 = pnand %p2223_p5, %p2676_p8 }
  0x4b   : > { %p2226_p11 = pneg %p2225_p10 }
  0x4d   : > { %p2231_p13 = pnand %p2229_p12, %p2226_p11 }
  0x4f   : > { %2234 = shalt.err (!%p2231_p13)
}
  0x50   : > { %s2235_s22 = scalar_lea.vmem %s2664_s24, 16  ;;  %s2242_s13 = scalar_lea.vmem %s2664_s24, 32 }
  0x51   : > { %p2236_p0 = scmp.ne.s32.totalorder %s2664_s24, %s2235_s22  ;;  %p2243_p7 = scmp.lt.s32.totalorder %s2664_s24, %s2664_s24 }
  0x52   : > { %p2244_p9 = scmp.lt.s32.totalorder %s2242_s13, %s2235_s22 }
  0x53   : > { %p2238_p2 = pnand %p2236_p0, %p2676_p8 }
  0x54   : > { %p2245_p5 = por %p2244_p9, %p2243_p7 }
  0x55   : > { %p2239_p4 = pneg %p2238_p2 }
  0x57   : > { %p2246_p10 = pnand %p2245_p5, %p2239_p4 }
  0x59   : > { %2249 = shalt.err (!%p2246_p10)
}
  0x5a   : > { %2067 = dma.hbm_to_vmem [thread:$0]  (!%p2660_p6), %s3212_s6, 16, %s2664_s24, [#allocation9]  }
  0x5b   : > { %s3213_s7 = sld [smem:[#allocation29_spill]] }
  0x61   : > { %s2250_s21 = scalar_lea.hbm %s3213_s7, 256 }
  0x62   : > { %p2251_p11 = scmp.ne.s32.totalorder %s3213_s7, %s2250_s21  ;;  %p2257_p0 = scmp.lt.u32.totalorder %s2250_s21, %s3213_s7 }
  0x64   : > { %p2253_p12 = pnand %p2251_p11, %p2676_p8 }
  0x66   : > { %p2254_p13 = pneg %p2253_p12 }
  0x68   : > { %p2259_p2 = pnand %p2257_p0, %p2254_p13 }
  0x6a   : > { %2262 = shalt.err (!%p2259_p2)
}
  0x6b   : > { %s2263_s13 = scalar_lea.vmem %s541_s26, 256  ;;  %p2271_p5 = scmp.lt.s32.totalorder %s541_s26, %s541_s26 }
  0x6c   : > { %p2264_p4 = scmp.ne.s32.totalorder %s541_s26, %s2263_s13  ;;  %p2272_p10 = scmp.lt.s32.totalorder %s2263_s13, %s2263_s13 }
  0x6e   : > { %p2266_p7 = pnand %p2264_p4, %p2676_p8  ;;  %p2273_p1 = por %p2272_p10, %p2271_p5 }
  0x70   : > { %p2267_p9 = pneg %p2266_p7 }
  0x72   : > { %p2274_p3 = pnand %p2273_p1, %p2267_p9 }
  0x74   : > { %2277 = shalt.err (!%p2274_p3)
}
  0x75   : > { %2070 = dma.hbm_to_vmem [thread:$0]  (!%p2660_p6), %s3213_s7, 256, %s541_s26, [#allocation9], %s2501_s17, %s2501_s17, %s2502_s14  }
  0x76   : > { %s2503_s11 = smov [#allocation11]   ;;  %s3214_s8 = sld [smem:[#allocation30_spill]] }
  0x77   : > { %s554_s15 = sshll.u32 %s2503_s11, 4  ;;  %s555_s15 = int_to_ptr.vmem [resolvable:$true] %s554_s15 }
  0x7c   : > { %s2278_s23 = scalar_lea.hbm %s3214_s8, 16 }
  0x7d   : > { %p2279_p1 = scmp.ne.s32.totalorder %s3214_s8, %s2278_s23  ;;  %p2285_p12 = scmp.lt.u32.totalorder %s2278_s23, %s3214_s8 }
  0x7f   : > { %p2281_p3 = pnand %p2279_p1, %p2676_p8 }
  0x81   : > { %p2282_p11 = pneg %p2281_p3 }
  0x83   : > { %p2287_p13 = pnand %p2285_p12, %p2282_p11 }
  0x85   : > { %2290 = shalt.err (!%p2287_p13)
}
  0x86   : > { %s2291_s26 = scalar_lea.vmem %s555_s15, 16  ;;  %s2298_s17 = scalar_lea.vmem %s555_s15, 32 }
  0x87   : > { %p2292_p0 = scmp.ne.s32.totalorder %s555_s15, %s2291_s26  ;;  %p2299_p7 = scmp.lt.s32.totalorder %s555_s15, %s555_s15 }
  0x88   : > { %p2300_p9 = scmp.lt.s32.totalorder %s2298_s17, %s2291_s26 }
  0x89   : > { %p2294_p2 = pnand %p2292_p0, %p2676_p8 }
  0x8a   : > { %p2301_p5 = por %p2300_p9, %p2299_p7 }
  0x8b   : > { %p2295_p4 = pneg %p2294_p2 }
  0x8d   : > { %p2302_p10 = pnand %p2301_p5, %p2295_p4 }
  0x8f   : > { %2305 = shalt.err (!%p2302_p10)
}
  0x90   : > { %2073 = dma.hbm_to_vmem [thread:$0]  (!%p2660_p6), %s3214_s8, 16, %s555_s15, [#allocation12]  }
  0x91   : > { %s1858_s16 = sadd.s32 4294967294, %s2496_s19   ;;  %s55_s4 = sadd.s32 1, %s2492_s0 }
  0x92   : > { %p57_p8 = scmp.ge.s32.totalorder %s55_s4, 2  ;;  %s64_s2 = sadd.s32 1, %s2484_s29 }
  0x93   : > { %p71_p1 = scmp.ne.s32.totalorder %s2484_s29, %s2480_s28  ;;  %p72_p3 = scmp.eq.s32.totalorder %s2496_s19, 0 }
  0x94   : > { %s3251_s4 = smov (%p57_p8, %s55_s4), 0  ;;  %p77_p12 = scmp.ne.s32.totalorder %s2480_s28, %s2476_s27 }
  0x95   : > { %p2772_p11 = por %p72_p3, %p71_p1  ;;  %s59_s15 = ssub.s32 %s2492_s0, %s3251_s4 }
  0x96   : > { %p463_p6 = scmp.eq.s32.totalorder %s2644_s1, 1  ;;  %p62_p13 = scmp.eq.s32.totalorder %s59_s15, 0 }
  0x97   : > { %p3216_p0 = scmp.eq.s32.totalorder %s2644_s1, 0  ;;  %p469_p7 = scmp.eq.s32.totalorder %s1858_s16, 1 }
  0x98   : > { %p2787_p4 = por %p463_p6, %p71_p1  ;;  %p2092_p5 = scmp.lt.s32.totalorder %s2496_s19, 2 }
  0x99   : > { %p2783_p2 = por %p3216_p0, %p77_p12  ;;  %p2794_p9 = por %p469_p7, %p77_p12 }
  0x9a   : > { %s3218_s21 = scalar_select %p2787_p4, 1, 0 }
  0x9b   : > { %s3217_s18 = scalar_select %p2783_p2, 1, 0 }
  0x9c   : > { %s2792_s23 = scalar_select %p62_p13, %s2484_s29, %s64_s2  }
  0x9d   : > { %s3219_s25 = scalar_select %p2794_p9, 1, 0 }
  0x9e   : > { %s2800_s12 = sand.u32 1, %s2484_s29   ;;  %s1866_s22 = sshll.u32 %s2492_s0, 7 }
  0x9f   : > { %s1865_s13 = sshll.u32 %s2800_s12, 3  ;;  %s3220_s14 = sld [smem:[#allocation23_spill]] }
  0xa0   : > { %s593_s16 = scalar_lea.vmem [#allocation2], %s1865_s13  ;;  %p2811_p10 = pnand %p2092_p5, %p2772_p11 }
  0xa1   : > { %s601_s2 = sshll.u32 %s593_s16, 4  ;;  %s590_s6 = scalar_lea.sflag [#allocation3], %s2800_s12  ;;  %s2815_s2 = int_to_ptr.vmem [resolvable:$true] %s601_s2 }
  0xa2   : > { %p2308_p1 = pneg %p2811_p10 }
  0xa5   : > { %s2807_s24 = scalar_lea.hbm %s3220_s14, %s1866_s22  ;;  %s2311_s13 = scalar_lea.hbm %s3220_s14, 256 }
  0xa6   : > { %s2306_s26 = scalar_lea.hbm %s2807_s24, 128  ;;  %p2312_p11 = scmp.lt.u32.totalorder %s2807_s24, %s3220_s14 }
  0xa7   : > { %p2307_p8 = scmp.ne.s32.totalorder %s2807_s24, %s2306_s26  ;;  %p2313_p6 = scmp.lt.u32.totalorder %s2311_s13, %s2306_s26 }
  0xa8   : > { %p2315_p0 = scmp.lt.u32.totalorder %s2306_s26, %s2807_s24 }
  0xa9   : > { %p2309_p3 = pnand %p2308_p1, %p2307_p8  ;;  %p2314_p13 = por %p2313_p6, %p2312_p11 }
  0xab   : > { %p2310_p12 = pneg %p2309_p3  ;;  %p2316_p7 = por %p2315_p0, %p2314_p13 }
  0xad   : > { %p2317_p5 = pnand %p2316_p7, %p2310_p12 }
  0xaf   : > { %2320 = shalt.err (!%p2317_p5)
}
  0xb0   : > { %s2321_s5 = scalar_lea.vmem %s2815_s2, 128  ;;  %s2504_s22 = smov [#allocation2]  }
  0xb1   : > { %p2322_p8 = scmp.ne.s32.totalorder %s2815_s2, %s2321_s5  ;;  %s2326_s11 = sshll.u32 %s2504_s22, 4  ;;  %s2327_s11 = int_to_ptr.vmem [resolvable:$false] %s2326_s11 }
  0xb2   : > { %s2328_s17 = scalar_lea.vmem %s2327_s11, 256  ;;  %p2329_p4 = scmp.lt.s32.totalorder %s2815_s2, %s2327_s11 }
  0xb3   : > { %p2324_p3 = pnand %p2322_p8, %p2308_p1  ;;  %p2330_p11 = scmp.lt.s32.totalorder %s2328_s17, %s2321_s5 }
  0xb5   : > { %p2325_p9 = pneg %p2324_p3  ;;  %p2331_p6 = por %p2330_p11, %p2329_p4 }
  0xb7   : > { %p2332_p13 = pnand %p2331_p6, %p2325_p9 }
  0xb9   : > { %2335 = shalt.err (!%p2332_p13)
}
  0xba   : > { %2077 = dma.hbm_to_vmem [thread:$0]  (!%p2811_p10), %s2807_s24, 128, %s2815_s2, %s590_s6  }
  0xbb   : > { %s1867_s26 = sshll.u32 %s2800_s12, 2  ;;  %s1868_s13 = sshll.u32 %s2492_s0, 6 }
  0xbc   : > { %s2849_s7 = scalar_lea.hbm %s3166_s3, %s1868_s13  ;;  %s628_s5 = scalar_lea.vmem [#allocation5], %s1867_s26 }
  0xbd   : > { %s636_s11 = sshll.u32 %s628_s5, 4  ;;  %s3222_s17 = sand.u32 1, %s2496_s19   ;;  %s637_s11 = int_to_ptr.vmem [resolvable:$true] %s636_s11 }
  0xbe   : > { %s625_s8 = scalar_lea.sflag [#allocation6], %s3222_s17  ;;  %s2336_s14 = scalar_lea.hbm %s2849_s7, 64 }
  0xbf   : > { %p2337_p4 = scmp.ne.s32.totalorder %s2849_s7, %s2336_s14  ;;  %s2341_s24 = scalar_lea.hbm %s3166_s3, 128 }
  0xc0   : > { %p2342_p0 = scmp.lt.u32.totalorder %s2849_s7, %s3166_s3  ;;  %p2343_p7 = scmp.lt.u32.totalorder %s2341_s24, %s2336_s14 }
  0xc1   : > { %p2339_p9 = pnand %p2337_p4, %p2308_p1  ;;  %p2345_p8 = scmp.lt.u32.totalorder %s2336_s14, %s2849_s7 }
  0xc2   : > { %p2344_p5 = por %p2343_p7, %p2342_p0 }
  0xc3   : > { %p2340_p12 = pneg %p2339_p9 }
  0xc4   : > { %p2346_p3 = por %p2345_p8, %p2344_p5 }
  0xc6   : > { %p2347_p11 = pnand %p2346_p3, %p2340_p12 }
  0xc8   : > { %2350 = shalt.err (!%p2347_p11)
}
  0xc9   : > { %s2351_s26 = scalar_lea.vmem %s637_s11, 64  ;;  %s2505_s16 = smov [#allocation5]  }
  0xca   : > { %p2352_p6 = scmp.ne.s32.totalorder %s637_s11, %s2351_s26  ;;  %s2356_s22 = sshll.u32 %s2505_s16, 4  ;;  %s2357_s22 = int_to_ptr.vmem [resolvable:$false] %s2356_s22 }
  0xcb   : > { %s2358_s5 = scalar_lea.vmem %s2357_s22, 128  ;;  %p2359_p9 = scmp.lt.s32.totalorder %s637_s11, %s2357_s22 }
  0xcc   : > { %p2354_p13 = pnand %p2352_p6, %p2308_p1  ;;  %p2360_p2 = scmp.lt.s32.totalorder %s2358_s5, %s2351_s26 }
  0xce   : > { %p2355_p4 = pneg %p2354_p13  ;;  %p2361_p0 = por %p2360_p2, %p2359_p9 }
  0xd0   : > { %p2362_p7 = pnand %p2361_p0, %p2355_p4 }
  0xd2   : > { %2365 = shalt.err (!%p2362_p7)
}
  0xd3   : > { %2080 = dma.hbm_to_vmem [thread:$0]  (!%p2811_p10), %s2849_s7, 64, %s637_s11, %s625_s8  }
  0xd4   : > { %p3223_p12 = scmp.ne.s32.totalorder %s3208_s20, 0 }
  0xd5   : > { %s2875_s14 = sand.u32 (!%p3223_p12), 1, %s2480_s28   ;;  %p3224_p2 = scmp.ne.s32.totalorder (!%p3223_p12), %s3217_s18, 0 }
  0xd6   : > { %655 = sbr.rel (%p3223_p12) target bundleno = 2733 (0xaad), region = 88  ;;  %s1870_s17 = sshll.u32 (!%p3223_p12), %s2875_s14, 3 }
  0xd7   : > { %s658_s6 = scalar_lea.sflag (!%p3223_p12), [#allocation3], %s2875_s14  ;;  %s661_s12 = scalar_lea.vmem (!%p3223_p12), [#allocation2], %s1870_s17 }
  0xdd   : > { %2447 = dma.done.wait (%p3224_p2), %s658_s6, 128  }
  0xde   : > { %2449 = vsyncadd (%p3224_p2), %s658_s6, 4294967168  ;;  %s666_s7 = sand.u32 1, %s2644_s1   ;;  %s1871_s8 = sshll.u32 %s2875_s14, 2 }
  0xdf   : > { %s667_s20 = scalar_lea.sflag [#allocation6], %s666_s7  ;;  %s2887_s15 = scalar_lea.vmem [#allocation5], %s1871_s8 }
  0xe0   : > { %2451 = dma.done.wait (%p3224_p2), %s667_s20, 64  }
  0xe1   : > { %2453 = vsyncadd (%p3224_p2), %s667_s20, 4294967232  ;;  %p3225_p10 = scmp.eq.s32.totalorder %s2644_s1, 0 }
  0xe3   : > { %2455 = dma.done.wait (%p3225_p10), [#allocation6], 256   ;;  %p3226_p1 = pmov %p3225_p10 }
  0xe5   : > { %2457 = vsyncadd (%p3226_p1), [#allocation6], 4294967040  ;;  %p3227_p5 = pmov %p3226_p1 }
  0xe6   : > { %p3228_p8 = pmov %p3226_p1 }
  0xe7   : > { %2459 = dma.done.wait (%p3227_p5), [#allocation9], 272  }
  0xe8   : > { %2461 = vsyncadd (%p3228_p8), [#allocation9], 4294967024  ;;  %p3229_p3 = pmov %p3226_p1 }
  0xe9   : > { %p3230_p11 = pmov %p3226_p1 }
  0xea   : > { %2463 = dma.done.wait (%p3229_p3), [#allocation12], 16  }
  0xeb   : > { %2465 = vsyncadd (%p3230_p11), [#allocation12], 4294967280  ;;  %vm797_vm0 = vcmask 261120   ;;  %v2905_v0 = vld [vmem:[%s661_s12] sm:$0xff]  ;;  %v2164_v7 = vld [vmem:[#allocation7] sm:$0xff]   ;;  %v2506_v8 = vmov 0.0  }
  0xec   : > { %v798_v1 = vsel %vm797_vm0, %v2905_v0, 0.0  ;;  %1953 = vmatprep.subr.bf16.mxu0 %v2506_v8  ;;  %vm2507_vm1 = vmmov 0   ;;  %v2165_v9 = vld [vmem:[#allocation7 + $0x8] sm:$0xff]   ;;  %1961 = vmatprep.subr.bf16.mxu1 %v2506_v8  ;;  %p766_p6 = scmp.lt.s32.totalorder %s2488_s30, 1  ;;  %vm908_vm2 = vcmask 64512   ;;  %s3231_s2 = sld [smem:[#allocation24_spill]] }
  0xed   : > { %799 = vadd.xlane.f32.xlu0 %v798_v1  ;;  %1957 = vmatprep.mubr.msk.bf16.mxu0 %vm2507_vm1, %v2506_v8  ;;  %v1883_v16 = vld [vmem:[%s3172_s9] ss:$0 sm:$0xff]  ;;  %v1885_v24 = vld [vmem:[#allocation8] ss:$0 sm:$0xff]  ;;  %s2508_s6 = smov 104   ;;  %s2509_s12 = smov 120  }
  0xee   : > { %1954 = vmatpush3.bf16.msra.mxu0 %v2164_v7  ;;  %1963 = vmatprep.mubr.msk.bf16.mxu1 %vm2507_vm1, %v2506_v8  ;;  %s2921_s1 = scalar_select %p766_p6, %s2488_s30, 1  ;;  %v1884_v18 = vld [vmem:[%s3173_s10] ss:$0 sm:$0xff]  ;;  %v793_v41 = vld [vmem:[%s2887_s15] sm:$0xf]  ;;  %vm1148_vm3 = vcmask 1043456  }
  0xef   : > { %1955 = vmatprep.subr.bf16.mxu0 %v2506_v8  ;;  %s2510_s7 = smov 112   ;;  %v907_v42 = vunpack.c.l.bf16 %v793_v41  ;;  %s3232_s15 = sld [smem:[#allocation25_spill]]  ;;  %vm1343_vm4 = vcmask 130048   ;;  %vm1345_vm5 = vcmask 195584   ;;  %vm1558_vm6 = vcmask 523264  }
  0xf0   : > { %s1920_s18 = sshll.u32 %s2921_s1, 4  ;;  %s2513_s26 = smov 16  }
  0xf1   : > { %s3233_s5 = sld [smem:[#allocation26_spill]]  ;;  %s3234_s8 = sld [smem:[#allocation31_spill]] }
  0xf2   : > { %1956 = vmatpush3.bf16.msra.mxu0 %v2165_v9  ;;  %s2929_s13 = scalar_lea.vmem %s3231_s2, %s1920_s18  ;;  %s2512_s2 = smov 8  }
  0xf3   : > { %1967 = vmatprep.subr.bf16.mxu0 %v2506_v8  ;;  %v785_v10 = vld [vmem:[%s2929_s13] sm:$0xf]  ;;  %v786_v22 = vld [vmem:[%s2929_s13 + $0x4] sm:$0xf]  ;;  %v787_v26 = vld [vmem:[%s2929_s13 + $0x8] sm:$0xf] }
  0xf4   : > { %v913_v11 = vsel %vm908_vm2, %v785_v10, 0  ;;  %v959_v23 = vsel %vm908_vm2, %v786_v22, 0  ;;  %v1005_v32 = vsel %vm908_vm2, %v787_v26, 0  ;;  %v788_v33 = vld [vmem:[%s2929_s13 + $0xc] sm:$0xf]  ;;  %s1882_s13 = sshll.u32 %s2921_s1, 3 }
  0xf5   : > { %1962 = vmatpush3.bf16.xpose.msra.mxu1 %v913_v11  ;;  %v1051_v36 = vsel %vm908_vm2, %v788_v33, 0  ;;  %s2975_s11 = scalar_lea.vmem %s3232_s15, %s1920_s18  ;;  %s1877_s18 = sshll.u32 %s2875_s14, 5 }
  0xf6   : > { %1973 = vmatprep.subr.bf16.mxu1 %v2506_v8  ;;  %v789_v10 = vld [vmem:[%s2975_s11] sm:$0xf]  ;;  %s2988_s24 = scalar_lea.vmem [#allocation14], %s1877_s18  ;;  %s3238_s22 = sld [smem:[#allocation32_spill]] }
  0xf7   : > { %v1150_v11 = vsel %vm1148_vm3, %v789_v10, 0  ;;  %s1611_s15 = scalar_lea.sflag [#allocation15], %s2875_s14  ;;  %p3240_p4 = scmp.ne.s32.totalorder %s3218_s21, 0 }
  0xf8   : > { %s2515_s18 = smov [#allocation14]  }
 0x17a   : > { %v800_v2 = vpop.xlane.xlu0 %799 }
 0x17b   : > { %v802_v3 = vmul.f32 0.03125, %v800_v2 }
 0x17d   : > { %v803_v4 = vsub.f32 %v2905_v0, %v802_v3 }
 0x17f   : > { %v804_v5 = vmul.f32 %v803_v4, %v803_v4 }
 0x181   : > { %v805_v6 = vsel %vm797_vm0, %v804_v5, 0.0 }
 0x182   : > { %806 = vadd.xlane.f32.xlu0 %v805_v6 }
 0x20f   : > { %v807_v12 = vpop.xlane.xlu0 %806 }
 0x210   : > { %v808_v13 = vmul.f32 0.03125, %v807_v12 }
 0x212   : > { %v809_v14 = vadd.f32 1e-06, %v808_v13 }
 0x214   : > { %2174 = vrsqrt.f32 %v809_v14 }
 0x21e   : > { %v2175_v15 = vpop.eup %2174 }
 0x21f   : > { %v811_v17 = vmul.f32 %v2175_v15, %v803_v4 }
 0x221   : > { %v818_v19 = vmul.f32 %v1883_v16, %v811_v17 }
 0x223   : > { %v825_v20 = vadd.f32 %v1884_v18, %v818_v19 }
 0x225   : > { %v826_v21 = vpack.c.bf16 %v825_v20, %v825_v20 }
 0x227   : > { %1958 = vmatmul.mubr.msk.bf16.vlgmr.msra.gmra.mrb[0].mxu0 %vm797_vm0, %v826_v21 }
 0x228   : > { %1969 = vmatprep.mubr.msk.bf16.mxu0 %vm2507_vm1, %v2506_v8  ;;  %1968 = vmatpush3.bf16.xpose.msra.mxu0 %v959_v23 }
 0x229   : > { %1979 = vmatprep.subr.bf16.mxu0 %v2506_v8 }
 0x2fa   : > { %v887_v25 = vpop.f32.mrb[0].mxu0 }
 0x2fb   : > { %v888_v27 = vadd.f32 %v1885_v24, %v887_v25  ;;  %v1959_v28 = vpop.f32.mrb[1].mxu0 }
 0x2fc   : > { %v890_v29 = vpop.f32.mrb[2].mxu0 }
 0x2fd   : > { %900 = vrot.lane.b32.xlu0 %v888_v27, %s2508_s6  ;;  %894 = vrot.lane.b32.xlu1 %v888_v27, %s2509_s12  ;;  %v1960_v30 = vpop.f32.mrb[3].mxu0  ;;  %v903_v31 = vpack.c.bf16 %v888_v27, %v888_v27  ;;  %s782_s6 = scalar_lea.vmem %s3233_s5, %s1882_s13  ;;  %s2514_s12 = smov 24  }
 0x2fe   : > { %s3235_s13 = sld [smem:[#allocation33_spill]]  ;;  %s1922_s5 = sshll.u32 %s2488_s30, 9 }
 0x2ff   : > { %1964 = vmatmul.mubr.msk.bf16.vlgmr.msra.gmra.mrb[0].mxu1 %vm908_vm2, %v903_v31  ;;  %v791_v31 = vld [vmem:[%s2975_s11 + $0x8] sm:$0xf] }
 0x300   : > { %1974 = vmatpush3.bf16.xpose.msra.mxu1 %v1005_v32  ;;  %1975 = vmatprep.mubr.msk.bf16.mxu1 %vm2507_vm1, %v2506_v8 }
 0x301   : > { %897 = vrot.lane.b32.xlu1 %v888_v27, %s2510_s7  ;;  %1985 = vmatprep.subr.bf16.mxu1 %v2506_v8  ;;  %v790_v27 = vld [vmem:[%s2975_s11 + $0x4] sm:$0xf]  ;;  %s3237_s7 = sld [smem:[#allocation36_spill]] }
 0x302   : > { %v1196_v28 = vsel %vm1148_vm3, %v790_v27, 0 }
 0x36f   : > { %v895_v34 = vpop.permute.xlu1 %894  ;;  %v901_v39 = vpop.permute.xlu0 %900 }
 0x370   : > { %v904_v35 = vpack.c.bf16 %v895_v34, %v895_v34  ;;  %v906_v40 = vpack.c.bf16 %v901_v39, %v901_v39  ;;  %v1242_v34 = vsel %vm1148_vm3, %v791_v31, 0  ;;  %v792_v39 = vld [vmem:[%s2975_s11 + $0xc] sm:$0xf] }
 0x371   : > { %v2171_v31 = vld [vmem:[%s3235_s13 + $0x8] sm:$0xff]  }
 0x372   : > { %1970 = vmatmul.mubr.msk.bf16.vlgmr.msra.gmra.mrb[4].mxu0 %vm908_vm2, %v904_v35 }
 0x373   : > { %1980 = vmatpush3.bf16.xpose.msra.mxu0 %v1051_v36  ;;  %v898_v37 = vpop.permute.xlu1 %897  ;;  %1981 = vmatprep.mubr.msk.bf16.mxu0 %vm2507_vm1, %v2506_v8 }
 0x374   : > { %v905_v38 = vpack.c.bf16 %v898_v37, %v898_v37  ;;  %1991 = vmatprep.subr.bf16.mxu0 %v2506_v8 }
 0x376   : > { %1976 = vmatmul.mubr.msk.bf16.vlgmr.msra.gmra.mrb[4].mxu1 %vm908_vm2, %v905_v38 }
 0x377   : > { %1987 = vmatprep.mubr.msk.bf16.mxu1 %vm2507_vm1, %v2506_v8  ;;  %1986 = vmatpush3.bf16.msra.mxu1 %v1150_v11 }
 0x378   : > { %1997 = vmatprep.subr.bf16.mxu1 %v2506_v8 }
 0x37a   : > { %1982 = vmatmul.mubr.msk.bf16.vlgmr.msra.gmra.mrb[8].mxu0 %vm908_vm2, %v906_v40 }
 0x37b   : > { %1993 = vmatprep.mubr.msk.bf16.mxu0 %vm2507_vm1, %v2506_v8  ;;  %1992 = vmatpush3.bf16.msra.mxu0 %v1196_v28 }
 0x37c   : > { %2003 = vmatprep.subr.bf16.mxu0 %v2506_v8 }
 0x3d2   : > { %v949_v43 = vpop.f32.mrb[0].mxu1 }
 0x3d3   : > { %v950_v44 = vadd.f32 %v949_v43, %v907_v42  ;;  %v1965_v45 = vpop.f32.mrb[1].mxu1 }
 0x3d4   : > { %v952_v46 = vpop.f32.mrb[2].mxu1 }
 0x3d5   : > { %v1966_v47 = vpop.f32.mrb[3].mxu1  ;;  %v1093_v48 = vsel %vm908_vm2, %v950_v44, -inf }
 0x3d6   : > { %1094 = vmax.xlane.f32.xlu1 %v1093_v48 }
 0x445   : > { %v995_v49 = vpop.f32.mrb[4].mxu0 }
 0x446   : > { %v996_v50 = vadd.f32 %v995_v49, %v907_v42  ;;  %v1971_v51 = vpop.f32.mrb[5].mxu0 }
 0x447   : > { %v998_v52 = vpop.f32.mrb[6].mxu0 }
 0x448   : > { %v1972_v53 = vpop.f32.mrb[7].mxu0  ;;  %v1096_v54 = vsel %vm908_vm2, %v996_v50, -inf }
 0x449   : > { %v1041_v55 = vpop.f32.mrb[4].mxu1  ;;  %1097 = vmax.xlane.f32.xlu0 %v1096_v54  ;;  %v2166_v53 = vld [vmem:[#allocation10] sm:$0xff]   ;;  %v2167_v54 = vld [vmem:[#allocation10 + $0x8] sm:$0xff]  }
 0x44a   : > { %v1042_v56 = vadd.f32 %v1041_v55, %v907_v42  ;;  %v1977_v57 = vpop.f32.mrb[5].mxu1 }
 0x44b   : > { %v1044_v58 = vpop.f32.mrb[6].mxu1 }
 0x44c   : > { %v1978_v59 = vpop.f32.mrb[7].mxu1  ;;  %v1099_v60 = vsel %vm908_vm2, %v1042_v56, -inf }
 0x44d   : > { %1100 = vmax.xlane.f32.xlu1 %v1099_v60  ;;  %v1087_v61 = vpop.f32.mrb[8].mxu0 }
 0x44e   : > { %v1088_v62 = vadd.f32 %v1087_v61, %v907_v42  ;;  %v1983_v63 = vpop.f32.mrb[9].mxu0  ;;  %v1288_v42 = vsel %vm1148_vm3, %v792_v39, 0 }
 0x44f   : > { %v1090_v1 = vpop.f32.mrb[10].mxu0 }
 0x450   : > { %v1984_v2 = vpop.f32.mrb[11].mxu0  ;;  %v1102_v3 = vsel %vm908_vm2, %v1088_v62, -inf }
 0x451   : > { %1103 = vmax.xlane.f32.xlu1 %v1102_v3 }
 0x463   : > { %v1095_v4 = vpop.xlane.xlu1 %1094 }
 0x464   : > { %v1105_v5 = vsub.f32 %v950_v44, %v1095_v4  ;;  %v794_v4 = vld [vmem:[%s782_s6] sm:$0xff]  ;;  %s3236_s6 = sld [smem:[#allocation35_spill]] }
 0x466   : > { %v1109_v6 = vmul.f32 1.442695, %v1105_v5 }
 0x468   : > { %2176 = vpow2.f32 %v1109_v6 }
 0x472   : > { %v2177_v7 = vpop.eup %2176 }
 0x473   : > { %v1117_v9 = vsel %vm908_vm2, %v2177_v7, 0.0 }
 0x474   : > { %1118 = vadd.xlane.f32.xlu1 %v1117_v9 }
 0x4d6   : > { %v1098_v12 = vpop.xlane.xlu0 %1097 }
 0x4d7   : > { %v1106_v13 = vsub.f32 %v996_v50, %v1098_v12 }
 0x4d9   : > { %v1111_v14 = vmul.f32 1.442695, %v1106_v13 }
 0x4da   : > { %v1101_v15 = vpop.xlane.xlu1 %1100 }
 0x4db   : > { %2178 = vpow2.f32 %v1111_v14  ;;  %v1107_v16 = vsub.f32 %v1042_v56, %v1101_v15  ;;  %v2511_v56 = vmov 0   ;;  %v1897_v14 = vld [vmem:[#allocation11] ss:$0 sm:$0xff] }
 0x4dc   : > { %2162 = vset.pattern.permute.xlu1 %v2511_v56  ;;  %2163 = vset.pattern.permute.xlu0 %v2511_v56 }
 0x4dd   : > { %v1113_v17 = vmul.f32 1.442695, %v1107_v16 }
 0x4de   : > { %v1104_v18 = vpop.xlane.xlu1 %1103 }
 0x4df   : > { %2180 = vpow2.f32 %v1113_v17  ;;  %v1108_v19 = vsub.f32 %v1088_v62, %v1104_v18 }
 0x4e1   : > { %v1115_v20 = vmul.f32 1.442695, %v1108_v19 }
 0x4e3   : > { %2182 = vpow2.f32 %v1115_v20 }
 0x4e5   : > { %v2179_v21 = vpop.eup %2178 }
 0x4e6   : > { %v1120_v22 = vsel %vm908_vm2, %v2179_v21, 0.0 }
 0x4e7   : > { %1121 = vadd.xlane.f32.xlu1 %v1120_v22 }
 0x4e9   : > { %v2181_v23 = vpop.eup %2180 }
 0x4ea   : > { %v1123_v24 = vsel %vm908_vm2, %v2181_v23, 0.0 }
 0x4eb   : > { %1124 = vadd.xlane.f32.xlu1 %v1123_v24 }
 0x4ed   : > { %v2183_v25 = vpop.eup %2182 }
 0x4ee   : > { %v1126_v26 = vsel %vm908_vm2, %v2183_v25, 0.0 }
 0x4ef   : > { %1127 = vadd.xlane.f32.xlu0 %v1126_v26 }
 0x501   : > { %v1119_v29 = vpop.xlane.xlu1 %1118 }
 0x502   : > { %2184 = vrcp.f32 %v1119_v29  ;;  %v2169_v29 = vld [vmem:[%s3234_s8 + $0x8] sm:$0xff]  }
 0x50c   : > { %v2185_v30 = vpop.eup %2184 }
 0x50d   : > { %v1133_v32 = vmul.f32 %v2185_v30, %v2177_v7  ;;  %v2170_v30 = vld [vmem:[%s3235_s13] sm:$0xff]  }
 0x50f   : > { %1137 = vst.msk [vmem:[%s2988_s24] sm:$0xff] %vm908_vm2, %v1133_v32  ;;  %v1141_v33 = vpack.c.bf16 %v1133_v32, %v1133_v32 }
 0x511   : > { %1988 = vmatmul.mubr.msk.bf16.vlgmr.msra.gmra.mrb[8].mxu1 %vm908_vm2, %v1141_v33 }
 0x512   : > { %1998 = vmatpush3.bf16.msra.mxu1 %v1242_v34  ;;  %1999 = vmatprep.mubr.msk.bf16.mxu1 %vm2507_vm1, %v2506_v8 }
 0x513   : > { %2009 = vmatprep.subr.bf16.mxu1 %v2506_v8 }
 0x574   : > { %v1122_v35 = vpop.xlane.xlu1 %1121 }
 0x575   : > { %2186 = vrcp.f32 %v1122_v35 }
 0x578   : > { %v1125_v36 = vpop.xlane.xlu1 %1124 }
 0x579   : > { %2188 = vrcp.f32 %v1125_v36  ;;  %v1901_v36 = vld [vmem:[%s3236_s6] ss:$0 sm:$0xff]  ;;  %s1639_s6 = sshll.u32 %s2988_s24, 4  ;;  %s3075_s6 = int_to_ptr.vmem [resolvable:$true] %s1639_s6 }
 0x57a   : > { %s2366_s11 = scalar_lea.vmem %s3075_s6, 512 }
 0x57b   : > { %p2367_p13 = scmp.ne.s32.totalorder %s3075_s6, %s2366_s11 }
 0x57c   : > { %v1128_v37 = vpop.xlane.xlu0 %1127 }
 0x57d   : > { %2190 = vrcp.f32 %v1128_v37  ;;  %p2368_p9 = pnand %p2367_p13, %p3240_p4 }
 0x57f   : > { %v2187_v38 = vpop.eup %2186  ;;  %p2369_p0 = pneg %p2368_p9 }
 0x580   : > { %v1134_v40 = vmul.f32 %v2187_v38, %v2179_v21  ;;  %v1902_v38 = vld [vmem:[%s3237_s7] ss:$0 sm:$0xff]  ;;  %s3239_s7 = sld [smem:[#allocation38_spill]] }
 0x582   : > { %1138 = vst.msk [vmem:[%s2988_s24 + $0x8] sm:$0xff] %vm908_vm2, %v1134_v40  ;;  %v1142_v41 = vpack.c.bf16 %v1134_v40, %v1134_v40 }
 0x583   : > { %v2189_v43 = vpop.eup %2188 }
 0x584   : > { %v1135_v44 = vmul.f32 %v2189_v43, %v2181_v23  ;;  %1994 = vmatmul.mubr.msk.bf16.vlgmr.msra.gmra.mrb[12].mxu0 %vm908_vm2, %v1142_v41  ;;  %v2173_v43 = vld [vmem:[%s3235_s13 + $0x18] sm:$0xff]  }
 0x585   : > { %2004 = vmatpush3.bf16.msra.mxu0 %v1288_v42  ;;  %2005 = vmatprep.mubr.msk.bf16.mxu0 %vm2507_vm1, %v2506_v8  ;;  %v2172_v42 = vld [vmem:[%s3235_s13 + $0x10] sm:$0xff]  }
 0x586   : > { %1139 = vst.msk [vmem:[%s2988_s24 + $0x10] sm:$0xff] %vm908_vm2, %v1135_v44  ;;  %v1143_v45 = vpack.c.bf16 %v1135_v44, %v1135_v44  ;;  %2017 = vmatprep.subr.bf16.mxu0 %v2506_v8  ;;  %v1903_v44 = vld [vmem:[%s3238_s22] ss:$0 sm:$0xff]  ;;  %s3073_s20 = scalar_lea.hbm %s3239_s7, %s1922_s5 }
 0x587   : > { %v2191_v46 = vpop.eup %2190 }
 0x588   : > { %v1136_v47 = vmul.f32 %v2191_v46, %v2183_v25  ;;  %2000 = vmatmul.mubr.msk.bf16.vlgmr.msra.gmra.mrb[12].mxu1 %vm908_vm2, %v1143_v45 }
 0x589   : > { %2013 = vmatprep.mubr.msk.bf16.mxu1 %vm2507_vm1, %v2506_v8  ;;  %2010 = vmatpush3.bf16.msra.mxu1 %v2166_v53 }
 0x58a   : > { %1140 = vst.msk [vmem:[%s2988_s24 + $0x18] sm:$0xff] %vm908_vm2, %v1136_v47  ;;  %v1144_v48 = vpack.c.bf16 %v1136_v47, %v1136_v47  ;;  %2011 = vmatprep.subr.bf16.mxu1 %v2506_v8 }
 0x58c   : > { %2006 = vmatmul.mubr.msk.bf16.vlgmr.msra.gmra.mrb[16].mxu0 %vm908_vm2, %v1144_v48 }
 0x58d   : > { %2021 = vmatprep.mubr.msk.bf16.mxu0 %vm2507_vm1, %v2506_v8  ;;  %2012 = vmatpush3.bf16.msra.mxu1 %v2167_v54 }
 0x58e   : > { %2025 = vmatprep.subr.bf16.mxu1 %v2506_v8 }
 0x5e4   : > { %v1186_v49 = vpop.f32.mrb[8].mxu1 }
 0x5e5   : > { %v1989_v50 = vpop.f32.mrb[9].mxu1 }
 0x5e6   : > { %v1189_v51 = vpop.f32.mrb[10].mxu1 }
 0x5e7   : > { %v1990_v52 = vpop.f32.mrb[11].mxu1 }
 0x657   : > { %v1232_v55 = vpop.f32.mrb[12].mxu0 }
 0x658   : > { %1331 = vrot.lane.b32.xlu1 %v1232_v55, %s2512_s2  ;;  %v1995_v57 = vpop.f32.mrb[13].mxu0 }
 0x659   : > { %v1235_v58 = vpop.f32.mrb[14].mxu0 }
 0x65a   : > { %v1996_v59 = vpop.f32.mrb[15].mxu0 }
 0x65b   : > { %v1278_v60 = vpop.f32.mrb[12].mxu1 }
 0x65c   : > { %1335 = vrot.lane.b32.xlu0 %v1278_v60, %s2513_s26  ;;  %v2001_v61 = vpop.f32.mrb[13].mxu1  ;;  %s2370_s26 = sshll.u32 %s2515_s18, 4  ;;  %s2371_s26 = int_to_ptr.vmem [resolvable:$false] %s2370_s26 }
 0x65d   : > { %v1281_v62 = vpop.f32.mrb[14].mxu1  ;;  %s2372_s24 = scalar_lea.vmem %s2371_s26, 1024  ;;  %p2373_p7 = scmp.lt.s32.totalorder %s3075_s6, %s2371_s26 }
 0x65e   : > { %v2002_v63 = vpop.f32.mrb[15].mxu1  ;;  %p2374_p12 = scmp.lt.s32.totalorder %s2372_s24, %s2366_s11 }
 0x65f   : > { %v1324_v1 = vpop.f32.mrb[16].mxu0 }
 0x660   : > { %1339 = vrot.lane.b32.xlu1 %v1324_v1, %s2514_s12  ;;  %v2007_v2 = vpop.f32.mrb[17].mxu0  ;;  %p2375_p2 = por %p2374_p12, %p2373_p7 }
 0x661   : > { %v1327_v3 = vpop.f32.mrb[18].mxu0 }
 0x662   : > { %v2008_v5 = vpop.f32.mrb[19].mxu0  ;;  %p2376_p10 = pnand %p2375_p2, %p2369_p0 }
 0x664   : > { %1417 = vperm.xlu1 %2162, %v794_v4  }
 0x6ca   : > { %v1332_v6 = vpop.permute.xlu1 %1331 }
 0x6cb   : > { %v1342_v9 = vsel %vm908_vm2, %v1186_v49, %v1332_v6 }
 0x6ce   : > { %v1336_v7 = vpop.permute.xlu0 %1335 }
 0x6cf   : > { %v1344_v10 = vsel %vm1343_vm4, %v1342_v9, %v1336_v7 }
 0x6d2   : > { %v1340_v11 = vpop.permute.xlu1 %1339 }
 0x6d3   : > { %v1346_v12 = vsel %vm1345_vm5, %v1344_v10, %v1340_v11 }
 0x6d4   : > { %v1347_v13 = vpack.c.bf16 %v1346_v12, %v1346_v12 }
 0x6d6   : > { %2014 = vmatmul.mubr.msk.bf16.vlgmr.msra.gmra.mrb[16].mxu1 %vm797_vm0, %v1347_v13 }
 0x6d7   : > { %2033 = vmatprep.mubr.msk.bf16.mxu1 %vm2507_vm1, %v2506_v8  ;;  %2026 = vmatpush3.bf16.msra.mxu1 %v2170_v30 }
 0x6d8   : > { %2027 = vmatprep.subr.bf16.mxu1 %v2506_v8 }
 0x6db   : > { %2028 = vmatpush3.bf16.msra.mxu1 %v2171_v31 }
 0x6dc   : > { %2029 = vmatprep.subr.bf16.mxu1 %v2506_v8 }
 0x6df   : > { %2030 = vmatpush3.bf16.msra.mxu1 %v2172_v42 }
 0x6e0   : > { %2031 = vmatprep.subr.bf16.mxu1 %v2506_v8 }
 0x6e3   : > { %v3026_v19 = vpop.permute.xlu1 %1417  ;;  %2032 = vmatpush3.bf16.msra.mxu1 %v2173_v43 }
 0x7a9   : > { %v1408_v15 = vpop.f32.mrb[16].mxu1 }
 0x7aa   : > { %v1409_v16 = vadd.f32 %v1897_v14, %v1408_v15  ;;  %v2015_v17 = vpop.f32.mrb[17].mxu1 }
 0x7ab   : > { %v1411_v18 = vpop.f32.mrb[18].mxu1 }
 0x7ac   : > { %v1414_v20 = vadd.f32 %v1409_v16, %v2905_v0  ;;  %v2016_v21 = vpop.f32.mrb[19].mxu1  ;;  %v2168_v0 = vld [vmem:[%s3234_s8] sm:$0xff]  }
 0x7ad   : > { %2018 = vmatpush3.bf16.msra.mxu0 %v2168_v0 }
 0x7ae   : > { %v3030_v22 = vmul.f32 %v3026_v19, %v1414_v20  ;;  %2019 = vmatprep.subr.bf16.mxu0 %v2506_v8 }
 0x7b0   : > { %v1423_v23 = vsel %vm797_vm0, %v3030_v22, 0.0 }
 0x7b1   : > { %1424 = vadd.xlane.f32.xlu0 %v1423_v23  ;;  %2020 = vmatpush3.bf16.msra.mxu0 %v2169_v29 }
 0x83e   : > { %v1425_v24 = vpop.xlane.xlu0 %1424 }
 0x83f   : > { %v1426_v25 = vmul.f32 0.03125, %v1425_v24 }
 0x841   : > { %v1427_v26 = vsub.f32 %v3030_v22, %v1426_v25 }
 0x843   : > { %v1428_v27 = vmul.f32 %v1427_v26, %v1427_v26 }
 0x845   : > { %v1429_v28 = vsel %vm797_vm0, %v1428_v27, 0.0 }
 0x846   : > { %1430 = vadd.xlane.f32.xlu1 %v1429_v28 }
 0x8d3   : > { %v1431_v32 = vpop.xlane.xlu1 %1430 }
 0x8d4   : > { %v1432_v33 = vmul.f32 0.03125, %v1431_v32 }
 0x8d6   : > { %v1433_v34 = vadd.f32 1e-06, %v1432_v33 }
 0x8d8   : > { %2192 = vrsqrt.f32 %v1433_v34 }
 0x8e2   : > { %v2193_v35 = vpop.eup %2192 }
 0x8e3   : > { %v1435_v37 = vmul.f32 %v2193_v35, %v1427_v26 }
 0x8e5   : > { %v1442_v39 = vmul.f32 %v1901_v36, %v1435_v37 }
 0x8e7   : > { %v1449_v40 = vadd.f32 %v1902_v38, %v1442_v39 }
 0x8e9   : > { %v1450_v41 = vpack.c.bf16 %v1449_v40, %v1449_v40 }
 0x8eb   : > { %2022 = vmatmul.mubr.msk.bf16.vlgmr.msra.gmra.mrb[20].mxu0 %vm797_vm0, %v1450_v41 }
 0x9be   : > { %v1511_v45 = vpop.f32.mrb[20].mxu0 }
 0x9bf   : > { %v1512_v46 = vadd.f32 %v1903_v44, %v1511_v45  ;;  %v2023_v47 = vpop.f32.mrb[21].mxu0 }
 0x9c0   : > { %v1514_v48 = vpop.f32.mrb[22].mxu0 }
 0x9c1   : > { %v1517_v49 = vmax.f32 %v1512_v46, 0.0  ;;  %v2024_v50 = vpop.f32.mrb[23].mxu0 }
 0x9c3   : > { %v1518_v51 = vpack.c.bf16 %v1517_v49, %v1517_v49 }
 0x9c5   : > { %2034 = vmatmul.mubr.msk.bf16.vlgmr.msra.gmra.mrb[20].mxu1 %vm1558_vm6, %v1518_v51 }
 0x9c6   : > { %2379 = shalt.err (!%p2376_p10)
}
 0x9c7   : > { %s2380_s16 = scalar_lea.hbm %s3073_s20, 512  ;;  %s2384_s12 = scalar_lea.hbm %s3239_s7, 1024 }
 0x9c8   : > { %p2381_p1 = scmp.ne.s32.totalorder %s3073_s20, %s2380_s16  ;;  %p2385_p3 = scmp.lt.u32.totalorder %s3073_s20, %s3239_s7 }
 0x9c9   : > { %p2386_p11 = scmp.lt.u32.totalorder %s2384_s12, %s2380_s16  ;;  %p2388_p13 = scmp.lt.u32.totalorder %s2380_s16, %s3073_s20 }
 0x9ca   : > { %p2382_p5 = pnand %p2381_p1, %p3240_p4 }
 0x9cb   : > { %p2387_p6 = por %p2386_p11, %p2385_p3 }
 0x9cc   : > { %p2383_p8 = pneg %p2382_p5 }
 0x9cd   : > { %p2389_p9 = por %p2388_p13, %p2387_p6 }
 0x9cf   : > { %p2390_p0 = pnand %p2389_p9, %p2383_p8 }
 0x9d1   : > { %2393 = shalt.err (!%p2390_p0)
}
 0x9d2   : > { %s2516_s11 = smov 128   ;;  %s3241_s22 = sld [smem:[#allocation34_spill]] }
 0x9d3   : > { %2058 = dma.vmem_to_hbm [thread:$0]  (%p3240_p4), %s3075_s6, 512, %s3073_s20, %s1611_s15, %s2516_s11, %s2516_s11, %s2512_s2  }
 0x9d4   : > { %s1915_s16 = sshll.u32 %s2488_s30, 7  ;;  %s758_s5 = scalar_lea.vmem [#allocation13], %s1870_s17 }
 0x9d5   : > { %s1625_s12 = sshll.u32 %s758_s5, 4  ;;  %s3242_s6 = sld [smem:[#allocation37_spill]]  ;;  %s3115_s12 = int_to_ptr.vmem [resolvable:$true] %s1625_s12 }
 0x9d6   : > { %s1606_s30 = scalar_lea.sflag [#allocation4], %s2875_s14  ;;  %s2394_s17 = scalar_lea.vmem %s3115_s12, 128 }
 0x9d7   : > { %p2395_p7 = scmp.ne.s32.totalorder %s3115_s12, %s2394_s17  ;;  %s2517_s15 = smov [#allocation13]  }
 0x9d8   : > { %v1907_v8 = vld [vmem:[%s3241_s22] ss:$0 sm:$0xff]  ;;  %s2398_s18 = sshll.u32 %s2517_s15, 4  ;;  %s2399_s18 = int_to_ptr.vmem [resolvable:$false] %s2398_s18 }
 0x9d9   : > { %p2396_p12 = pnand %p2395_p7, %p3240_p4  ;;  %s2400_s11 = scalar_lea.vmem %s2399_s18, 256 }
 0x9da   : > { %p2401_p10 = scmp.lt.s32.totalorder %s3115_s12, %s2399_s18  ;;  %p2402_p1 = scmp.lt.s32.totalorder %s2400_s11, %s2394_s17 }
 0x9db   : > { %s3113_s20 = scalar_lea.hbm %s3242_s6, %s1915_s16  ;;  %p2397_p2 = pneg %p2396_p12 }
 0x9dc   : > { %p2403_p5 = por %p2402_p1, %p2401_p10 }
 0x9de   : > { %p2404_p8 = pnand %p2403_p5, %p2397_p2 }
 0xa98   : > { %v1596_v52 = vpop.f32.mrb[20].mxu1 }
 0xa99   : > { %v1597_v53 = vadd.f32 %v1907_v8, %v1596_v52  ;;  %v2035_v54 = vpop.f32.mrb[21].mxu1 }
 0xa9a   : > { %v1599_v55 = vpop.f32.mrb[22].mxu1 }
 0xa9b   : > { %v1602_v56 = vadd.f32 %v1597_v53, %v3030_v22  ;;  %v2036_v57 = vpop.f32.mrb[23].mxu1 }
 0xa9d   : > { %v1603_v58 = vmul.f32 %v1602_v56, %v3026_v19 }
 0xa9f   : > { %1604 = vst.msk [vmem:[%s758_s5] sm:$0xff] %vm797_vm0, %v1603_v58 }
 0xaa0   : > { %2407 = shalt.err (!%p2404_p8)
}
 0xaa1   : > { %s2408_s14 = scalar_lea.hbm %s3113_s20, 128  ;;  %s2412_s22 = scalar_lea.hbm %s3242_s6, 256 }
 0xaa2   : > { %p2409_p3 = scmp.ne.s32.totalorder %s3113_s20, %s2408_s14  ;;  %p2413_p13 = scmp.lt.u32.totalorder %s3113_s20, %s3242_s6 }
 0xaa3   : > { %p2414_p9 = scmp.lt.u32.totalorder %s2412_s22, %s2408_s14  ;;  %p2416_p7 = scmp.lt.u32.totalorder %s2408_s14, %s3113_s20 }
 0xaa4   : > { %p2410_p11 = pnand %p2409_p3, %p3240_p4 }
 0xaa5   : > { %p2415_p0 = por %p2414_p9, %p2413_p13 }
 0xaa6   : > { %p2411_p6 = pneg %p2410_p11 }
 0xaa7   : > { %p2417_p12 = por %p2416_p7, %p2415_p0 }
 0xaa9   : > { %p2418_p2 = pnand %p2417_p12, %p2411_p6 }
 0xaab   : > { %2421 = shalt.err (!%p2418_p2)
}
 0xaac   : > { %2057 = dma.vmem_to_hbm [thread:$0]  (%p3240_p4), %s3115_s12, 128, %s3113_s20, %s1606_s30  }
 0xaad PF: > { %s1654_s1 = sand.u32 1, %s2476_s27   ;;  %p3243_p10 = scmp.ne.s32.totalorder %s3219_s25, 0 }
 0xaae   : > { %p3244_p1 = scmp.ge.s32.totalorder %s2496_s19, 2  ;;  %s1655_s2 = scalar_lea.sflag [#allocation4], %s1654_s1 }
 0xab0   : > { %p2082_p5 = pnand %p3244_p1, %p3243_p10 }
 0xab2   : > { %2467 = dma.done.wait (!%p2082_p5), %s1655_s2, 128  }
 0xab3   : > { %2469 = vsyncadd (!%p2082_p5), %s1655_s2, 4294967168  ;;  %s1664_s17 = scalar_lea.sflag [#allocation15], %s1654_s1 }
 0xab4   : > { %2471 = dma.done.wait (!%p2082_p5), %s1664_s17, 512  }
 0xab5   : > { %2473 = vsyncadd (!%p2082_p5), %s1664_s17, 4294966784  ;;  %s43_s19 = sadd.s32 1, %s2496_s19   ;;  %s3245_s27 = smov %s2480_s28 }
 0xab6   : > { %p40_p8 = scmp.ge.s32.totalorder %s43_s19, 4   ;;  %s3246_s28 = smov %s2484_s29 }
 0xab7   : > { %s3247_s29 = smov %s2792_s23  ;;  %s3248_s30 = smov %s2492_s0 }
 0xab8   : > { %s3249_s0 = smov %s3251_s4  ;;  %42 = sbr.rel (!%p40_p8) target bundleno = 29 (0x1d), region = 188 }
 0xabf   :  { %1669 = vsyncpa [#allocation3], 1 }
 0xac0   :  { %1671 = vsyncpa [#allocation3 + $0x1], 1 }
 0xac1   :  { %1672 = vsyncpa [#allocation6], 1 }
 0xac2   :  { %1674 = vsyncpa [#allocation6 + $0x1], 1 }
 0xac3   :  { %1675 = vsyncpa [#allocation9], 1 }
 0xac4   :  { %1676 = vsyncpa [#allocation12], 1 }
 0xac5   :  { %1677 = vsyncpa [#allocation4], 1 }
 0xac6   :  { %1679 = vsyncpa [#allocation4 + $0x1], 1 }
 0xac7   :  { %1680 = vsyncpa [#allocation15], 1 }
 0xac8   :  { %1682 = vsyncpa [#allocation15 + $0x1], 1 }

</bundles_post_ra>
